<compile_context>
chip_gen: v6e
topology: v6e:2x2x1
jax: 0.10.0
libtpu: 0.0.40
codegen_flags: <defaults>
</compile_context>

<pallas_src>
import jax
import jax.numpy as jnp
from jax import lax
from jax.experimental import pallas as pl
from jax.experimental.pallas import tpu as pltpu


def _round_up(x, m):
    return ((x + m - 1) // m) * m


def _vmem_limit_bytes():
    """3/4 of physical VMEM capped at 100 MiB (v5e/v6e -> 96 MiB, v7x -> 48 MiB)."""
    cap = 64 * 1024 * 1024
    try:
        hw = pltpu.get_tpu_info().vmem_capacity_bytes
        if isinstance(hw, int) and hw > 0:
            cap = hw
    except Exception:
        pass
    return int(min(cap * 3 // 4, 100 * 1024 * 1024))


# -----------------------------------------------------------------------------
# Fused kernel: one image per grid step.
#   ph_ref : (1, Ho, Wo, 4*Cin) bf16 — the four 2x2 phase planes of the NHWC
#            input, concatenated along channels in order [p00|p01|p10|p11]
#            where pRC = x[:, R::2, C::2, :].
#   w1_ref : (9*Cin, Cp) bf16   — conv1 weights, (kh, kw, cin) flattened.
#   w2_ref : (3, 3*Cp, Cp) bf16 — conv2 weights, (kw, cin) flattened per kh.
#   o_ref  : (1, Ho, Wo, Cp) bf16 output (channel-padded, lane-dense).
#   s_ee/s_eo/s_oe/s_oo : bf16 scratch — reflection-padded stride-2 phase
#            planes of the padded input xp:  s_ee[a,b]=xp[2a,2b],
#            s_eo[a,b]=xp[2a,2b+1], s_oe[a,b]=xp[2a+1,2b], s_oo[a,b]=xp[2a+1,2b+1].
#   s_y    : (Ho+2, Wo, 3*Cp) bf16 scratch — prebuilt conv2 im2col slab:
#            s_y[i, l, dx*Cp:(dx+1)*Cp] = y1_padded[i, l+dx].
# -----------------------------------------------------------------------------
def _unet_down_kernel(ph_ref, w1_ref, w2_ref, o_ref,
                      s_ee, s_eo, s_oe, s_oo, s_y):
    Ho, Wo, Cp = o_ref.shape[1], o_ref.shape[2], o_ref.shape[3]
    Cin = ph_ref.shape[3] // 4
    eps = 1e-5

    ph = ph_ref[0]                              # (Ho, Wo, 4*Cin) bf16
    p00 = ph[:, :, 0 * Cin:1 * Cin]             # even rows, even cols
    p01 = ph[:, :, 1 * Cin:2 * Cin]             # even rows, odd  cols
    p10 = ph[:, :, 2 * Cin:3 * Cin]             # odd  rows, even cols
    p11 = ph[:, :, 3 * Cin:4 * Cin]             # odd  rows, odd  cols

    # --- assemble reflection-padded stride-2 phase planes (bf16, VMEM) -----
    s_ee[1:Ho + 1, 1:Wo + 1, :] = p11
    s_ee[0:1, 1:Wo + 1, :] = p11[0:1]
    s_ee[:, 0:1, :] = s_ee[:, 1:2, :]

    s_eo[1:Ho + 1, :, :] = p10
    s_eo[0:1, :, :] = p10[0:1]

    s_oe[:, 1:Wo + 1, :] = p01
    s_oe[:, 0:1, :] = s_oe[:, 1:2, :]

    s_oo[...] = p00

    # --- conv1: 3x3 stride 2 as ONE 9-tap im2col dot (K = 9*Cin) -----------
    #     (bias dropped: InstanceNorm(affine=False) cancels it exactly)
    taps = []
    for dy in range(3):
        r0 = 1 if dy == 2 else 0
        sE = s_oe if dy == 1 else s_ee          # even-column plane for this dy
        sO = s_oo if dy == 1 else s_eo          # odd-column  plane for this dy
        taps.append(sE[r0:r0 + Ho, 0:Wo, :])    # dx = 0
        taps.append(sO[r0:r0 + Ho, 0:Wo, :])    # dx = 1
        taps.append(sE[r0:r0 + Ho, 1:Wo + 1, :])  # dx = 2
    tap1 = jnp.concatenate(taps, axis=-1)       # (Ho, Wo, 9*Cin) bf16
    acc = lax.dot_general(
        tap1, w1_ref[...],
        dimension_numbers=(((2,), (0,)), ((), ())),
        preferred_element_type=jnp.float32)

    # --- InstanceNorm (single-pass stats) + ReLU, cast to bf16 once --------
    m1 = jnp.mean(acc, axis=(0, 1), keepdims=True)
    q1 = jnp.mean(acc * acc, axis=(0, 1), keepdims=True)
    v1 = jnp.maximum(q1 - m1 * m1, 0.0)
    y1 = jnp.maximum((acc - m1) * lax.rsqrt(v1 + eps), 0.0).astype(jnp.bfloat16)

    # --- prebuild conv2 im2col slab (reflection-padded, dx-folded) ---------
    # s_y[i, l, dx*Cp:(dx+1)*Cp] = y1p[i, l+dx], y1p = ReflectionPad2d(1)(y1)
    s_y[1:Ho + 1, :, Cp:2 * Cp] = y1                               # dx = 1
    s_y[1:Ho + 1, 1:Wo, 0:Cp] = y1[:, 0:Wo - 1, :]                 # dx = 0
    s_y[1:Ho + 1, 0:1, 0:Cp] = y1[:, 1:2, :]
    s_y[1:Ho + 1, 0:Wo - 1, 2 * Cp:3 * Cp] = y1[:, 1:Wo, :]        # dx = 2
    s_y[1:Ho + 1, Wo - 1:Wo, 2 * Cp:3 * Cp] = y1[:, Wo - 2:Wo - 1, :]
    s_y[0:1, :, :] = s_y[2:3, :, :]                                # row reflect
    s_y[Ho + 1:Ho + 2, :, :] = s_y[Ho - 1:Ho, :, :]

    # --- conv2: 3x3 stride 1, dx-folded dots (K = 3*Cp) --------------------
    acc2 = jnp.zeros((Ho, Wo, Cp), jnp.float32)
    for dy in range(3):
        acc2 += lax.dot_general(
            s_y[dy:dy + Ho, :, :], w2_ref[dy],
            dimension_numbers=(((2,), (0,)), ((), ())),
            preferred_element_type=jnp.float32)

    m2 = jnp.mean(acc2, axis=(0, 1), keepdims=True)
    q2 = jnp.mean(acc2 * acc2, axis=(0, 1), keepdims=True)
    v2 = jnp.maximum(q2 - m2 * m2, 0.0)
    o_ref[0] = jnp.maximum((acc2 - m2) * lax.rsqrt(v2 + eps), 0.0
                           ).astype(o_ref.dtype)


# -----------------------------------------------------------------------------
# NHWC entry point (bf16 out, channel padding removed) — use this for chaining.
# -----------------------------------------------------------------------------
def unet_down_forward_nhwc(params, x_nhwc):
    N, H, W, Cin = x_nhwc.shape
    assert H % 2 == 0 and W % 2 == 0 and H >= 4 and W >= 4
    Ho, Wo = H // 2, W // 2

    out_ch = params["w1"].shape[-1]
    Cp = _round_up(out_ch, 128)                 # lane-dense output channels

    # bf16 at the HBM boundary; 2x2 space-to-depth phase split concatenated
    # channel-wise -> one kernel input / one DMA per grid step.
    xb = x_nhwc.astype(jnp.bfloat16)
    phases = jnp.concatenate(
        [xb[:, 0::2, 0::2, :], xb[:, 0::2, 1::2, :],
         xb[:, 1::2, 0::2, :], xb[:, 1::2, 1::2, :]], axis=-1)   # (N,Ho,Wo,4*Cin)

    # Weights: pad Cout (and conv2 Cin) to Cp, flatten K, cast bf16.  Biases
    # are NOT passed: InstanceNorm(affine=False) cancels per-channel bias.
    w1 = jnp.pad(params["w1"].astype(jnp.float32),
                 ((0, 0), (0, 0), (0, 0), (0, Cp - out_ch)))
    w1 = w1.reshape(9 * Cin, Cp).astype(jnp.bfloat16)
    w2 = jnp.pad(params["w2"].astype(jnp.float32),
                 ((0, 0), (0, 0), (0, Cp - out_ch), (0, Cp - out_ch)))
    w2 = w2.reshape(3, 3 * Cp, Cp).astype(jnp.bfloat16)

    out = pl.pallas_call(
        _unet_down_kernel,
        out_shape=jax.ShapeDtypeStruct((N, Ho, Wo, Cp), jnp.bfloat16),
        grid=(N,),
        in_specs=[
            pl.BlockSpec((1, Ho, Wo, 4 * Cin), lambda n: (n, 0, 0, 0)),
            pl.BlockSpec((9 * Cin, Cp), lambda n: (0, 0)),
            pl.BlockSpec((3, 3 * Cp, Cp), lambda n: (0, 0, 0)),
        ],
        out_specs=pl.BlockSpec((1, Ho, Wo, Cp), lambda n: (n, 0, 0, 0)),
        scratch_shapes=[
            pltpu.VMEM((Ho + 1, Wo + 1, Cin), jnp.bfloat16),   # s_ee
            pltpu.VMEM((Ho + 1, Wo, Cin), jnp.bfloat16),       # s_eo
            pltpu.VMEM((Ho, Wo + 1, Cin), jnp.bfloat16),       # s_oe
            pltpu.VMEM((Ho, Wo, Cin), jnp.bfloat16),           # s_oo
            pltpu.VMEM((Ho + 2, Wo, 3 * Cp), jnp.bfloat16),    # conv2 im2col slab
        ],
        compiler_params=pltpu.CompilerParams(
            dimension_semantics=("parallel",),                 # batch across TCs
            vmem_limit_bytes=_vmem_limit_bytes()),
    )(phases, w1, w2)

    return out[..., :out_ch]                    # drop channel padding (bf16 NHWC)


# -----------------------------------------------------------------------------
# NCHW edge wrapper (PyTorch UnetDown.forward semantics, f32 out)
# -----------------------------------------------------------------------------
def unet_down_forward(params, x_nchw):
    x = jnp.transpose(x_nchw, (0, 2, 3, 1))                    # NHWC
    y = unet_down_forward_nhwc(params, x)
    return jnp.transpose(y, (0, 3, 1, 2)).astype(jnp.float32)  # NCHW f32


# -----------------------------------------------------------------------------
# Pure-JAX reference (keeps the conv bias -> proves the bias cancellation)
# -----------------------------------------------------------------------------
def _ref_block(x, w, b, stride):
    xp = jnp.pad(x, ((0, 0), (1, 1), (1, 1), (0, 0)), mode="reflect")
    y = lax.conv_general_dilated(
        xp.astype(jnp.bfloat16), w.astype(jnp.bfloat16),
        window_strides=(stride, stride), padding="VALID",
        dimension_numbers=("NHWC", "HWIO", "NHWC"),
        preferred_element_type=jnp.float32)
    y = y + b[None, None, None, :]
    m = jnp.mean(y, axis=(1, 2), keepdims=True)
    v = jnp.mean((y - m) ** 2, axis=(1, 2), keepdims=True)
    return jnp.maximum((y - m) * lax.rsqrt(v + 1e-5), 0.0)


def unet_down_reference(params, x_nchw):
    x = jnp.transpose(x_nchw, (0, 2, 3, 1)).astype(jnp.float32)
    y = _ref_block(x, params["w1"], params["b1"], 2)
    y = _ref_block(y, params["w2"], params["b2"], 1)
    return jnp.transpose(y, (0, 3, 1, 2))


# -----------------------------------------------------------------------------
# Deterministic parameter init (shapes per UnetDown.__init__)
# -----------------------------------------------------------------------------
def init_params(key, in_ch, out_ch):
    k1, k2, k3, k4 = jax.random.split(key, 4)
    s1 = 1.0 / jnp.sqrt(in_ch * 9.0)
    s2 = 1.0 / jnp.sqrt(out_ch * 9.0)
    return {
        # HWIO layout (kh, kw, Cin, Cout)
        "w1": jax.random.uniform(k1, (3, 3, in_ch, out_ch), jnp.float32, -s1, s1),
        "b1": jax.random.uniform(k2, (out_ch,), jnp.float32, -s1, s1),
        "w2": jax.random.uniform(k3, (3, 3, out_ch, out_ch), jnp.float32, -s2, s2),
        "b2": jax.random.uniform(k4, (out_ch,), jnp.float32, -s2, s2),
    }


def _run_case(key, in_ch, out_ch, batch, H, W, tol):
    kp, kx = jax.random.split(key)
    params = init_params(kp, in_ch, out_ch)
    x = jax.random.normal(kx, (batch, in_ch, H, W), jnp.float32)

    out = jax.block_until_ready(jax.jit(unet_down_forward)(params, x))
    ref = jax.block_until_ready(unet_down_reference(params, x))

    assert out.shape == (batch, out_ch, H // 2, W // 2), out.shape
    # Tolerance covers bf16 operand / intermediate / output rounding.
    err = float(jnp.max(jnp.abs(out - ref)))
    assert err < tol, (err, tol)


if __name__ == "__main__":
    key = jax.random.PRNGKey(0)
    k1, k2 = jax.random.split(key)

    # Small-Cin case (K = 9*Cin = 36 single conv1 dot).
    _run_case(k1, in_ch=4, out_ch=8, batch=2, H=16, W=16, tol=5e-2)
    # Lane-aligned-Cin case (concat is lane-aligned, K = 9*128 = 1152).
    _run_case(k2, in_ch=128, out_ch=128, batch=1, H=8, W=8, tol=5e-2)

    print("KERNEL_OK")
</pallas_src>

<mosaic_0001>
module attributes {stable_mosaic.version = 11 : i64} {
  func.func @_unet_down_kernel(%arg0: i32, %arg1: memref<1x8x8x16xbf16, #tpu.memory_space<vmem>>, %arg2: memref<36x128xbf16, #tpu.memory_space<vmem>>, %arg3: memref<3x384x128xbf16, #tpu.memory_space<vmem>>, %arg4: memref<1x8x8x128xbf16, #tpu.memory_space<vmem>>, %arg5: memref<9x9x4xbf16, #tpu.memory_space<vmem>>, %arg6: memref<9x8x4xbf16, #tpu.memory_space<vmem>>, %arg7: memref<8x9x4xbf16, #tpu.memory_space<vmem>>, %arg8: memref<8x8x4xbf16, #tpu.memory_space<vmem>>, %arg9: memref<10x8x384xbf16, #tpu.memory_space<vmem>>) attributes {dimension_semantics = [#tpu.dimension_semantics<parallel>], iteration_bounds = array<i64: 2>, scalar_prefetch = 0 : i64, scratch_operands = 5 : i64, tpu.core_type = #tpu.core_type<tc>, window_params = [{transform_indices = @transform_0, window_bounds = array<i64: 1, 8, 8, 16>}, {pipeline_mode = #tpu.pipeline_mode<synchronous>, transform_indices = @transform_1, window_bounds = array<i64: 36, 128>}, {pipeline_mode = #tpu.pipeline_mode<synchronous>, transform_indices = @transform_2, window_bounds = array<i64: 3, 384, 128>}, {transform_indices = @transform_3, window_bounds = array<i64: 1, 8, 8, 128>}]} {
    %c0 = arith.constant 0 : index
    %c0_0 = arith.constant 0 : index
    %c0_1 = arith.constant 0 : index
    %c0_2 = arith.constant 0 : index
    %0 = vector.load %arg1[%c0, %c0_0, %c0_1, %c0_2] : memref<1x8x8x16xbf16, #tpu.memory_space<vmem>>, vector<1x8x8x16xbf16>
    %1 = vector.shape_cast %0 : vector<1x8x8x16xbf16> to vector<8x8x16xbf16>
    %2 = vector.extract_strided_slice %1 {offsets = [0, 0, 0], sizes = [8, 8, 4], strides = [1, 1, 1]} : vector<8x8x16xbf16> to vector<8x8x4xbf16>
    %3 = vector.extract_strided_slice %1 {offsets = [0, 0, 4], sizes = [8, 8, 4], strides = [1, 1, 1]} : vector<8x8x16xbf16> to vector<8x8x4xbf16>
    %4 = vector.extract_strided_slice %1 {offsets = [0, 0, 8], sizes = [8, 8, 4], strides = [1, 1, 1]} : vector<8x8x16xbf16> to vector<8x8x4xbf16>
    %5 = vector.extract_strided_slice %1 {offsets = [0, 0, 12], sizes = [8, 8, 4], strides = [1, 1, 1]} : vector<8x8x16xbf16> to vector<8x8x4xbf16>
    %c1 = arith.constant 1 : index
    %c1_3 = arith.constant 1 : index
    %c0_4 = arith.constant 0 : index
    %6 = vector.load %arg5[%c1, %c1_3, %c0_4] : memref<9x9x4xbf16, #tpu.memory_space<vmem>>, vector<8x8x4xbf16>
    tpu.vector_store %arg5[%c1, %c1_3, %c0_4], %5 {strides = array<i32>} : memref<9x9x4xbf16, #tpu.memory_space<vmem>>, vector<8x8x4xbf16>,
    %7 = vector.extract_strided_slice %5 {offsets = [0, 0, 0], sizes = [1, 8, 4], strides = [1, 1, 1]} : vector<8x8x4xbf16> to vector<1x8x4xbf16>
    %c0_5 = arith.constant 0 : index
    %c1_6 = arith.constant 1 : index
    %c0_7 = arith.constant 0 : index
    %8 = vector.load %arg5[%c0_5, %c1_6, %c0_7] : memref<9x9x4xbf16, #tpu.memory_space<vmem>>, vector<1x8x4xbf16>
    tpu.vector_store %arg5[%c0_5, %c1_6, %c0_7], %7 {strides = array<i32>} : memref<9x9x4xbf16, #tpu.memory_space<vmem>>, vector<1x8x4xbf16>,
    %c0_8 = arith.constant 0 : index
    %c1_9 = arith.constant 1 : index
    %c0_10 = arith.constant 0 : index
    %9 = vector.load %arg5[%c0_8, %c1_9, %c0_10] : memref<9x9x4xbf16, #tpu.memory_space<vmem>>, vector<9x1x4xbf16>
    %c0_11 = arith.constant 0 : index
    %c0_12 = arith.constant 0 : index
    %c0_13 = arith.constant 0 : index
    %10 = vector.load %arg5[%c0_11, %c0_12, %c0_13] : memref<9x9x4xbf16, #tpu.memory_space<vmem>>, vector<9x1x4xbf16>
    tpu.vector_store %arg5[%c0_11, %c0_12, %c0_13], %9 {strides = array<i32>} : memref<9x9x4xbf16, #tpu.memory_space<vmem>>, vector<9x1x4xbf16>,
    %c1_14 = arith.constant 1 : index
    %c0_15 = arith.constant 0 : index
    %c0_16 = arith.constant 0 : index
    %11 = vector.load %arg6[%c1_14, %c0_15, %c0_16] : memref<9x8x4xbf16, #tpu.memory_space<vmem>>, vector<8x8x4xbf16>
    tpu.vector_store %arg6[%c1_14, %c0_15, %c0_16], %4 {strides = array<i32>} : memref<9x8x4xbf16, #tpu.memory_space<vmem>>, vector<8x8x4xbf16>,
    %12 = vector.extract_strided_slice %4 {offsets = [0, 0, 0], sizes = [1, 8, 4], strides = [1, 1, 1]} : vector<8x8x4xbf16> to vector<1x8x4xbf16>
    %c0_17 = arith.constant 0 : index
    %c0_18 = arith.constant 0 : index
    %c0_19 = arith.constant 0 : index
    %13 = vector.load %arg6[%c0_17, %c0_18, %c0_19] : memref<9x8x4xbf16, #tpu.memory_space<vmem>>, vector<1x8x4xbf16>
    tpu.vector_store %arg6[%c0_17, %c0_18, %c0_19], %12 {strides = array<i32>} : memref<9x8x4xbf16, #tpu.memory_space<vmem>>, vector<1x8x4xbf16>,
    %c0_20 = arith.constant 0 : index
    %c1_21 = arith.constant 1 : index
    %c0_22 = arith.constant 0 : index
    %14 = vector.load %arg7[%c0_20, %c1_21, %c0_22] : memref<8x9x4xbf16, #tpu.memory_space<vmem>>, vector<8x8x4xbf16>
    tpu.vector_store %arg7[%c0_20, %c1_21, %c0_22], %3 {strides = array<i32>} : memref<8x9x4xbf16, #tpu.memory_space<vmem>>, vector<8x8x4xbf16>,
    %c0_23 = arith.constant 0 : index
    %c1_24 = arith.constant 1 : index
    %c0_25 = arith.constant 0 : index
    %15 = vector.load %arg7[%c0_23, %c1_24, %c0_25] : memref<8x9x4xbf16, #tpu.memory_space<vmem>>, vector<8x1x4xbf16>
    %c0_26 = arith.constant 0 : index
    %c0_27 = arith.constant 0 : index
    %c0_28 = arith.constant 0 : index
    %16 = vector.load %arg7[%c0_26, %c0_27, %c0_28] : memref<8x9x4xbf16, #tpu.memory_space<vmem>>, vector<8x1x4xbf16>
    tpu.vector_store %arg7[%c0_26, %c0_27, %c0_28], %15 {strides = array<i32>} : memref<8x9x4xbf16, #tpu.memory_space<vmem>>, vector<8x1x4xbf16>,
    %c0_29 = arith.constant 0 : index
    %c0_30 = arith.constant 0 : index
    %c0_31 = arith.constant 0 : index
    %17 = vector.load %arg8[%c0_29, %c0_30, %c0_31] : memref<8x8x4xbf16, #tpu.memory_space<vmem>>, vector<8x8x4xbf16>
    tpu.vector_store %arg8[%c0_29, %c0_30, %c0_31], %2 {strides = array<i32>} : memref<8x8x4xbf16, #tpu.memory_space<vmem>>, vector<8x8x4xbf16>,
    %c0_32 = arith.constant 0 : index
    %c0_33 = arith.constant 0 : index
    %c0_34 = arith.constant 0 : index
    %18 = vector.load %arg5[%c0_32, %c0_33, %c0_34] : memref<9x9x4xbf16, #tpu.memory_space<vmem>>, vector<8x8x4xbf16>
    %c0_35 = arith.constant 0 : index
    %c0_36 = arith.constant 0 : index
    %c0_37 = arith.constant 0 : index
    %19 = vector.load %arg6[%c0_35, %c0_36, %c0_37] : memref<9x8x4xbf16, #tpu.memory_space<vmem>>, vector<8x8x4xbf16>
    %c0_38 = arith.constant 0 : index
    %c1_39 = arith.constant 1 : index
    %c0_40 = arith.constant 0 : index
    %20 = vector.load %arg5[%c0_38, %c1_39, %c0_40] : memref<9x9x4xbf16, #tpu.memory_space<vmem>>, vector<8x8x4xbf16>
    %c0_41 = arith.constant 0 : index
    %c0_42 = arith.constant 0 : index
    %c0_43 = arith.constant 0 : index
    %21 = vector.load %arg7[%c0_41, %c0_42, %c0_43] : memref<8x9x4xbf16, #tpu.memory_space<vmem>>, vector<8x8x4xbf16>
    %c0_44 = arith.constant 0 : index
    %c0_45 = arith.constant 0 : index
    %c0_46 = arith.constant 0 : index
    %22 = vector.load %arg8[%c0_44, %c0_45, %c0_46] : memref<8x8x4xbf16, #tpu.memory_space<vmem>>, vector<8x8x4xbf16>
    %c0_47 = arith.constant 0 : index
    %c1_48 = arith.constant 1 : index
    %c0_49 = arith.constant 0 : index
    %23 = vector.load %arg7[%c0_47, %c1_48, %c0_49] : memref<8x9x4xbf16, #tpu.memory_space<vmem>>, vector<8x8x4xbf16>
    %c1_50 = arith.constant 1 : index
    %c0_51 = arith.constant 0 : index
    %c0_52 = arith.constant 0 : index
    %24 = vector.load %arg5[%c1_50, %c0_51, %c0_52] : memref<9x9x4xbf16, #tpu.memory_space<vmem>>, vector<8x8x4xbf16>
    %c1_53 = arith.constant 1 : index
    %c0_54 = arith.constant 0 : index
    %c0_55 = arith.constant 0 : index
    %25 = vector.load %arg6[%c1_53, %c0_54, %c0_55] : memref<9x8x4xbf16, #tpu.memory_space<vmem>>, vector<8x8x4xbf16>
    %c1_56 = arith.constant 1 : index
    %c1_57 = arith.constant 1 : index
    %c0_58 = arith.constant 0 : index
    %26 = vector.load %arg5[%c1_56, %c1_57, %c0_58] : memref<9x9x4xbf16, #tpu.memory_space<vmem>>, vector<8x8x4xbf16>
    %27 = tpu.concatenate %18, %19, %20, %21, %22, %23, %24, %25, %26 in 2 : vector<8x8x4xbf16>, vector<8x8x4xbf16>, vector<8x8x4xbf16>, vector<8x8x4xbf16>, vector<8x8x4xbf16>, vector<8x8x4xbf16>, vector<8x8x4xbf16>, vector<8x8x4xbf16>, vector<8x8x4xbf16> -> vector<8x8x36xbf16>
    %c0_59 = arith.constant 0 : index
    %c0_60 = arith.constant 0 : index
    %28 = vector.load %arg2[%c0_59, %c0_60] : memref<36x128xbf16, #tpu.memory_space<vmem>>, vector<36x128xbf16>
    %cst = arith.constant dense<0.000000e+00> : vector<8x8x128xf32>
    %29 = tpu.matmul %27, %28, %cst {dimension_numbers = #tpu.dot_dimension_numbers<[2], [0], [0, 1], [1], [0, 0, 0, 1, 1, 1], [], []>} : vector<8x8x36xbf16>, vector<36x128xbf16>, vector<8x8x128xf32> -> vector<8x8x128xf32>
    %cst_61 = arith.constant dense<0.000000e+00> : vector<128xf32>
    %30 = vector.multi_reduction <add>, %29, %cst_61 [0, 1] : vector<8x8x128xf32> to vector<128xf32>
    %31 = vector.shape_cast %30 : vector<128xf32> to vector<1x1x128xf32>
    %cst_62 = arith.constant 6.400000e+01 : f32
    %32 = vector.broadcast %cst_62 : f32 to vector<1x1x128xf32>
    %33 = arith.divf %31, %32 : vector<1x1x128xf32>
    %34 = arith.mulf %29, %29 : vector<8x8x128xf32>
    %cst_63 = arith.constant dense<0.000000e+00> : vector<128xf32>
    %35 = vector.multi_reduction <add>, %34, %cst_63 [0, 1] : vector<8x8x128xf32> to vector<128xf32>
    %36 = vector.shape_cast %35 : vector<128xf32> to vector<1x1x128xf32>
    %cst_64 = arith.constant 6.400000e+01 : f32
    %37 = vector.broadcast %cst_64 : f32 to vector<1x1x128xf32>
    %38 = arith.divf %36, %37 : vector<1x1x128xf32>
    %39 = arith.mulf %33, %33 : vector<1x1x128xf32>
    %40 = arith.subf %38, %39 : vector<1x1x128xf32>
    %cst_65 = arith.constant 0.000000e+00 : f32
    %41 = vector.broadcast %cst_65 : f32 to vector<1x1x128xf32>
    %42 = arith.maximumf %40, %41 : vector<1x1x128xf32>
    %43 = vector.broadcast %33 : vector<1x1x128xf32> to vector<8x8x128xf32>
    %44 = arith.subf %29, %43 : vector<8x8x128xf32>
    %cst_66 = arith.constant 9.99999974E-6 : f32
    %45 = vector.broadcast %cst_66 : f32 to vector<1x1x128xf32>
    %46 = arith.addf %42, %45 : vector<1x1x128xf32>
    %47 = math.rsqrt %46 : vector<1x1x128xf32>
    %48 = vector.broadcast %47 : vector<1x1x128xf32> to vector<8x8x128xf32>
    %49 = arith.mulf %44, %48 : vector<8x8x128xf32>
    %cst_67 = arith.constant 0.000000e+00 : f32
    %50 = vector.broadcast %cst_67 : f32 to vector<8x8x128xf32>
    %51 = arith.maximumf %49, %50 : vector<8x8x128xf32>
    %52 = arith.truncf %51 : vector<8x8x128xf32> to vector<8x8x128xbf16>
    %c1_68 = arith.constant 1 : index
    %c0_69 = arith.constant 0 : index
    %c128 = arith.constant 128 : index
    %53 = vector.load %arg9[%c1_68, %c0_69, %c128] : memref<10x8x384xbf16, #tpu.memory_space<vmem>>, vector<8x8x128xbf16>
    tpu.vector_store %arg9[%c1_68, %c0_69, %c128], %52 {strides = array<i32>} : memref<10x8x384xbf16, #tpu.memory_space<vmem>>, vector<8x8x128xbf16>,
    %54 = vector.extract_strided_slice %52 {offsets = [0, 0, 0], sizes = [8, 7, 128], strides = [1, 1, 1]} : vector<8x8x128xbf16> to vector<8x7x128xbf16>
    %c1_70 = arith.constant 1 : index
    %c1_71 = arith.constant 1 : index
    %c0_72 = arith.constant 0 : index
    %55 = vector.load %arg9[%c1_70, %c1_71, %c0_72] : memref<10x8x384xbf16, #tpu.memory_space<vmem>>, vector<8x7x128xbf16>
    tpu.vector_store %arg9[%c1_70, %c1_71, %c0_72], %54 {strides = array<i32>} : memref<10x8x384xbf16, #tpu.memory_space<vmem>>, vector<8x7x128xbf16>,
    %56 = vector.extract_strided_slice %52 {offsets = [0, 1, 0], sizes = [8, 1, 128], strides = [1, 1, 1]} : vector<8x8x128xbf16> to vector<8x1x128xbf16>
    %c1_73 = arith.constant 1 : index
    %c0_74 = arith.constant 0 : index
    %c0_75 = arith.constant 0 : index
    %57 = vector.load %arg9[%c1_73, %c0_74, %c0_75] : memref<10x8x384xbf16, #tpu.memory_space<vmem>>, vector<8x1x128xbf16>
    tpu.vector_store %arg9[%c1_73, %c0_74, %c0_75], %56 {strides = array<i32>} : memref<10x8x384xbf16, #tpu.memory_space<vmem>>, vector<8x1x128xbf16>,
    %58 = vector.extract_strided_slice %52 {offsets = [0, 1, 0], sizes = [8, 7, 128], strides = [1, 1, 1]} : vector<8x8x128xbf16> to vector<8x7x128xbf16>
    %c1_76 = arith.constant 1 : index
    %c0_77 = arith.constant 0 : index
    %c256 = arith.constant 256 : index
    %59 = vector.load %arg9[%c1_76, %c0_77, %c256] : memref<10x8x384xbf16, #tpu.memory_space<vmem>>, vector<8x7x128xbf16>
    tpu.vector_store %arg9[%c1_76, %c0_77, %c256], %58 {strides = array<i32>} : memref<10x8x384xbf16, #tpu.memory_space<vmem>>, vector<8x7x128xbf16>,
    %60 = vector.extract_strided_slice %52 {offsets = [0, 6, 0], sizes = [8, 1, 128], strides = [1, 1, 1]} : vector<8x8x128xbf16> to vector<8x1x128xbf16>
    %c1_78 = arith.constant 1 : index
    %c7 = arith.constant 7 : index
    %c256_79 = arith.constant 256 : index
    %61 = vector.load %arg9[%c1_78, %c7, %c256_79] : memref<10x8x384xbf16, #tpu.memory_space<vmem>>, vector<8x1x128xbf16>
    tpu.vector_store %arg9[%c1_78, %c7, %c256_79], %60 {strides = array<i32>} : memref<10x8x384xbf16, #tpu.memory_space<vmem>>, vector<8x1x128xbf16>,
    %c2 = arith.constant 2 : index
    %c0_80 = arith.constant 0 : index
    %c0_81 = arith.constant 0 : index
    %62 = vector.load %arg9[%c2, %c0_80, %c0_81] : memref<10x8x384xbf16, #tpu.memory_space<vmem>>, vector<1x8x384xbf16>
    %c0_82 = arith.constant 0 : index
    %c0_83 = arith.constant 0 : index
    %c0_84 = arith.constant 0 : index
    %63 = vector.load %arg9[%c0_82, %c0_83, %c0_84] : memref<10x8x384xbf16, #tpu.memory_space<vmem>>, vector<1x8x384xbf16>
    tpu.vector_store %arg9[%c0_82, %c0_83, %c0_84], %62 {strides = array<i32>} : memref<10x8x384xbf16, #tpu.memory_space<vmem>>, vector<1x8x384xbf16>,
    %c7_85 = arith.constant 7 : index
    %c0_86 = arith.constant 0 : index
    %c0_87 = arith.constant 0 : index
    %64 = vector.load %arg9[%c7_85, %c0_86, %c0_87] : memref<10x8x384xbf16, #tpu.memory_space<vmem>>, vector<1x8x384xbf16>
    %c9 = arith.constant 9 : index
    %c0_88 = arith.constant 0 : index
    %c0_89 = arith.constant 0 : index
    %65 = vector.load %arg9[%c9, %c0_88, %c0_89] : memref<10x8x384xbf16, #tpu.memory_space<vmem>>, vector<1x8x384xbf16>
    tpu.vector_store %arg9[%c9, %c0_88, %c0_89], %64 {strides = array<i32>} : memref<10x8x384xbf16, #tpu.memory_space<vmem>>, vector<1x8x384xbf16>,
    %cst_90 = arith.constant 0.000000e+00 : f32
    %66 = vector.broadcast %cst_90 : f32 to vector<8x8x128xf32>
    %c0_91 = arith.constant 0 : index
    %c0_92 = arith.constant 0 : index
    %c0_93 = arith.constant 0 : index
    %67 = vector.load %arg9[%c0_91, %c0_92, %c0_93] : memref<10x8x384xbf16, #tpu.memory_space<vmem>>, vector<8x8x384xbf16>
    %c0_94 = arith.constant 0 : index
    %c0_95 = arith.constant 0 : index
    %c0_96 = arith.constant 0 : index
    %68 = vector.load %arg3[%c0_94, %c0_95, %c0_96] : memref<3x384x128xbf16, #tpu.memory_space<vmem>>, vector<1x384x128xbf16>
    %69 = vector.shape_cast %68 : vector<1x384x128xbf16> to vector<384x128xbf16>
    %cst_97 = arith.constant dense<0.000000e+00> : vector<8x8x128xf32>
    %70 = tpu.matmul %67, %69, %cst_97 {dimension_numbers = #tpu.dot_dimension_numbers<[2], [0], [0, 1], [1], [0, 0, 0, 1, 1, 1], [], []>} : vector<8x8x384xbf16>, vector<384x128xbf16>, vector<8x8x128xf32> -> vector<8x8x128xf32>
    %71 = arith.addf %66, %70 : vector<8x8x128xf32>
    %c1_98 = arith.constant 1 : index
    %c0_99 = arith.constant 0 : index
    %c0_100 = arith.constant 0 : index
    %72 = vector.load %arg9[%c1_98, %c0_99, %c0_100] : memref<10x8x384xbf16, #tpu.memory_space<vmem>>, vector<8x8x384xbf16>
    %c1_101 = arith.constant 1 : index
    %c0_102 = arith.constant 0 : index
    %c0_103 = arith.constant 0 : index
    %73 = vector.load %arg3[%c1_101, %c0_102, %c0_103] : memref<3x384x128xbf16, #tpu.memory_space<vmem>>, vector<1x384x128xbf16>
    %74 = vector.shape_cast %73 : vector<1x384x128xbf16> to vector<384x128xbf16>
    %cst_104 = arith.constant dense<0.000000e+00> : vector<8x8x128xf32>
    %75 = tpu.matmul %72, %74, %cst_104 {dimension_numbers = #tpu.dot_dimension_numbers<[2], [0], [0, 1], [1], [0, 0, 0, 1, 1, 1], [], []>} : vector<8x8x384xbf16>, vector<384x128xbf16>, vector<8x8x128xf32> -> vector<8x8x128xf32>
    %76 = arith.addf %71, %75 : vector<8x8x128xf32>
    %c2_105 = arith.constant 2 : index
    %c0_106 = arith.constant 0 : index
    %c0_107 = arith.constant 0 : index
    %77 = vector.load %arg9[%c2_105, %c0_106, %c0_107] : memref<10x8x384xbf16, #tpu.memory_space<vmem>>, vector<8x8x384xbf16>
    %c2_108 = arith.constant 2 : index
    %c0_109 = arith.constant 0 : index
    %c0_110 = arith.constant 0 : index
    %78 = vector.load %arg3[%c2_108, %c0_109, %c0_110] : memref<3x384x128xbf16, #tpu.memory_space<vmem>>, vector<1x384x128xbf16>
    %79 = vector.shape_cast %78 : vector<1x384x128xbf16> to vector<384x128xbf16>
    %cst_111 = arith.constant dense<0.000000e+00> : vector<8x8x128xf32>
    %80 = tpu.matmul %77, %79, %cst_111 {dimension_numbers = #tpu.dot_dimension_numbers<[2], [0], [0, 1], [1], [0, 0, 0, 1, 1, 1], [], []>} : vector<8x8x384xbf16>, vector<384x128xbf16>, vector<8x8x128xf32> -> vector<8x8x128xf32>
    %81 = arith.addf %76, %80 : vector<8x8x128xf32>
    %cst_112 = arith.constant dense<0.000000e+00> : vector<128xf32>
    %82 = vector.multi_reduction <add>, %81, %cst_112 [0, 1] : vector<8x8x128xf32> to vector<128xf32>
    %83 = vector.shape_cast %82 : vector<128xf32> to vector<1x1x128xf32>
    %cst_113 = arith.constant 6.400000e+01 : f32
    %84 = vector.broadcast %cst_113 : f32 to vector<1x1x128xf32>
    %85 = arith.divf %83, %84 : vector<1x1x128xf32>
    %86 = arith.mulf %81, %81 : vector<8x8x128xf32>
    %cst_114 = arith.constant dense<0.000000e+00> : vector<128xf32>
    %87 = vector.multi_reduction <add>, %86, %cst_114 [0, 1] : vector<8x8x128xf32> to vector<128xf32>
    %88 = vector.shape_cast %87 : vector<128xf32> to vector<1x1x128xf32>
    %cst_115 = arith.constant 6.400000e+01 : f32
    %89 = vector.broadcast %cst_115 : f32 to vector<1x1x128xf32>
    %90 = arith.divf %88, %89 : vector<1x1x128xf32>
    %91 = arith.mulf %85, %85 : vector<1x1x128xf32>
    %92 = arith.subf %90, %91 : vector<1x1x128xf32>
    %cst_116 = arith.constant 0.000000e+00 : f32
    %93 = vector.broadcast %cst_116 : f32 to vector<1x1x128xf32>
    %94 = arith.maximumf %92, %93 : vector<1x1x128xf32>
    %95 = vector.broadcast %85 : vector<1x1x128xf32> to vector<8x8x128xf32>
    %96 = arith.subf %81, %95 : vector<8x8x128xf32>
    %cst_117 = arith.constant 9.99999974E-6 : f32
    %97 = vector.broadcast %cst_117 : f32 to vector<1x1x128xf32>
    %98 = arith.addf %94, %97 : vector<1x1x128xf32>
    %99 = math.rsqrt %98 : vector<1x1x128xf32>
    %100 = vector.broadcast %99 : vector<1x1x128xf32> to vector<8x8x128xf32>
    %101 = arith.mulf %96, %100 : vector<8x8x128xf32>
    %cst_118 = arith.constant 0.000000e+00 : f32
    %102 = vector.broadcast %cst_118 : f32 to vector<8x8x128xf32>
    %103 = arith.maximumf %101, %102 : vector<8x8x128xf32>
    %104 = arith.truncf %103 : vector<8x8x128xf32> to vector<8x8x128xbf16>
    %c0_119 = arith.constant 0 : index
    %c0_120 = arith.constant 0 : index
    %c0_121 = arith.constant 0 : index
    %c0_122 = arith.constant 0 : index
    %105 = vector.load %arg4[%c0_119, %c0_120, %c0_121, %c0_122] : memref<1x8x8x128xbf16, #tpu.memory_space<vmem>>, vector<1x8x8x128xbf16>
    %106 = vector.shape_cast %105 : vector<1x8x8x128xbf16> to vector<8x8x128xbf16>
    %107 = vector.shape_cast %104 : vector<8x8x128xbf16> to vector<1x8x8x128xbf16>
    tpu.vector_store %arg4[%c0_119, %c0_120, %c0_121, %c0_122], %107 {strides = array<i32>} : memref<1x8x8x128xbf16, #tpu.memory_space<vmem>>, vector<1x8x8x128xbf16>,
    return
  }
  func.func @transform_0(%arg0: i32) -> (i32, i32, i32, i32) {
    %c0_i32 = arith.constant 0 : i32
    %c0_i32_0 = arith.constant 0 : i32
    %c0_i32_1 = arith.constant 0 : i32
    %c0_i32_2 = arith.constant 0 : i32
    return %arg0, %c0_i32, %c0_i32_0, %c0_i32_1 : i32, i32, i32, i32
  }
  func.func @transform_1(%arg0: i32) -> (i32, i32) {
    %c0_i32 = arith.constant 0 : i32
    %c0_i32_0 = arith.constant 0 : i32
    %c0_i32_1 = arith.constant 0 : i32
    return %c0_i32, %c0_i32_0 : i32, i32
  }
  func.func @transform_2(%arg0: i32) -> (i32, i32, i32) {
    %c0_i32 = arith.constant 0 : i32
    %c0_i32_0 = arith.constant 0 : i32
    %c0_i32_1 = arith.constant 0 : i32
    %c0_i32_2 = arith.constant 0 : i32
    return %c0_i32, %c0_i32_0, %c0_i32_1 : i32, i32, i32
  }
  func.func @transform_3(%arg0: i32) -> (i32, i32, i32, i32) {
    %c0_i32 = arith.constant 0 : i32
    %c0_i32_0 = arith.constant 0 : i32
    %c0_i32_1 = arith.constant 0 : i32
    %c0_i32_2 = arith.constant 0 : i32
    return %arg0, %c0_i32, %c0_i32_0, %c0_i32_1 : i32, i32, i32, i32
  }
}

</mosaic_0001>

<bundles_post_ra>
// kernel: unet_down_forward.1
= control target key start
LH: loop header
LB: loop body
LE: loop exit
PB: predicated region body
PF: predicated region fallthrough
CT: control target
= control target key end

     0   :  { %s4033_s12 = smov 0   ;;  %s4998_s0 = inlined_call_operand.vmem [shape: bf16[2,8,8,16], index: 0, kind: input, shape index: {}]   ;;  %s4999_s1 = inlined_call_operand.vmem [shape: bf16[36,128], index: 1, kind: input, shape index: {}]   ;;  %s5000_s2 = inlined_call_operand.vmem [shape: bf16[3,384,128], index: 2, kind: input, shape index: {}]   ;;  %s5001_s3 = inlined_call_operand.vmem [shape: bf16[2,8,8,128], index: 3, kind: output, shape index: {}]  }
   0x1 LB: > { %s3213_s13 = sadd.s32 4294967295, %s4000_s12   ;;  %p3217_p0 = scmp.ge.s32.totalorder %s4000_s12, 1  ;;  %s4000_s12 = sphi %s4033_s12, %s13_s12  }
   0x2   : > { %p137_p1 = scmp.lt.s32.totalorder %s4000_s12, 3 }
   0x4   : > { %p138_p2 = pnand %p3217_p0, %p137_p1 }
   0x5   : > { %p161_p3 = scmp.lt.s32.totalorder (!%p138_p2), %s3213_s13, 1  ;;  %s4002_s18 = smov (!%p138_p2), 116  }
   0x6   : > { %141 = sbr.rel (%p138_p2) target bundleno = 1053 (0x41d), region = 32  ;;  %s4003_s19 = smov (!%p138_p2), 124  }
   0x7   : > { %s4004_s20 = smov (!%p138_p2), 120   ;;  %s4005_s21 = smov (!%p138_p2), 16  }
   0x8   : > { %s4006_s22 = smov (!%p138_p2), 4   ;;  %s4007_s23 = smov (!%p138_p2), 28  }
   0x9   : > { %s4008_s24 = smov (!%p138_p2), 12   ;;  %s4009_s25 = smov (!%p138_p2), 24  }
   0xa   : > { %s4010_s26 = smov (!%p138_p2), 8   ;;  %s4011_s6 = smov (!%p138_p2), 20  }
   0xb   : > { %s5015_s13 = smov (!%p161_p3, %s3213_s13), 1  ;;  %vm293_vm0 = vcmask 27648   ;;  %vm294_vm1 = vsmask.f32 7938  ;;  %v311_v53 = vld [vmem:[#allocation2 + $0x18] sm:$0xf] }
   0xc   : > { %s3528_s14 = sshll.u32 %s5015_s13, 5  ;;  %vm4143_vm2 = vmand %vm293_vm0, %vm294_vm1  ;;  %v296_v54 = vld [vmem:[#allocation2 + $0x8] sm:$0xf]  ;;  %v347_v55 = vld [vmem:[#allocation2] sm:$0xf]  ;;  %vm299_vm3 = vcmask 24576  }
   0xd   : > { %s165_s17 = scalar_lea.vmem %s4998_s0, %s3528_s14  ;;  %v533_v61 = vld [vmem:[#allocation4] sm:$0xf]  ;;  %v305_v62 = vld [vmem:[#allocation2 + $0x10] sm:$0xf]  ;;  %vm300_vm4 = vsmask.f32 256  ;;  %s170_s10 = scalar_lea.vmem %s5001_s3, %s3528_s14 }
   0xe   : > { %v4049_v0 = vld [vmem:[%s165_s17 + $0x8] sm:$0xf]  ;;  %v4051_v1 = vld [vmem:[%s165_s17] sm:$0xf]  ;;  %v4053_v2 = vld [vmem:[%s165_s17 + $0x4] sm:$0xf] }
   0xf   : > { %v197_v3 = vshrl.u32 %v4049_v0, 16  ;;  %v200_v4 = vshll.u32 %v4049_v0, 16  ;;  %662 = vst.msk [vmem:[#allocation5 + $0x8] sm:$0xf] %vm293_vm0, %v4049_v0  ;;  %v181_v5 = vshrl.u32 %v4051_v1, 16  ;;  %v184_v6 = vshll.u32 %v4051_v1, 16  ;;  %vm4158_vm5 = vmand %vm299_vm3, %vm300_vm4 }
  0x10   : > { %660 = vst.msk [vmem:[#allocation5] sm:$0xf] %vm293_vm0, %v4051_v1  ;;  %661 = vst.msk [vmem:[#allocation5 + $0x4] sm:$0xf] %vm293_vm0, %v4053_v2  ;;  %v4065_v7 = vld [vmem:[%s165_s17 + $0xc] sm:$0xf] }
  0x11   : > { %v189_v8 = vshrl.u32 %v4053_v2, 16  ;;  %663 = vst.msk [vmem:[#allocation5 + $0xc] sm:$0xf] %vm293_vm0, %v4065_v7  ;;  %v4070_v9 = vld [vmem:[%s165_s17 + $0x14] sm:$0xf]  ;;  %v199_v10 = vrot.slane %v197_v3, 7 }
  0x12   : > { %v183_v11 = vrot.slane %v181_v5, 7  ;;  %v192_v12 = vshll.u32 %v4053_v2, 16  ;;  %665 = vst.msk [vmem:[#allocation5 + $0x14] sm:$0xf] %vm293_vm0, %v4070_v9  ;;  %v4075_v13 = vld [vmem:[%s165_s17 + $0x10] sm:$0xf] }
  0x13   : > { %v191_v14 = vrot.slane %v189_v8, 7  ;;  %664 = vst.msk [vmem:[#allocation5 + $0x10] sm:$0xf] %vm293_vm0, %v4075_v13  ;;  %v4079_v15 = vld [vmem:[%s165_s17 + $0x18] sm:$0xf]  ;;  %v202_v16 = vor.u32 %v200_v4, %v199_v10  ;;  %v205_v19 = vshrl.u32 %v4065_v7, 16 }
  0x14   : > { %v186_v17 = vor.u32 %v184_v6, %v183_v11  ;;  %666 = vst.msk [vmem:[#allocation5 + $0x18] sm:$0xf] %vm293_vm0, %v4079_v15  ;;  %v4083_v18 = vld [vmem:[%s165_s17 + $0x1c] sm:$0xf]  ;;  %v208_v22 = vshll.u32 %v4065_v7, 16  ;;  %v221_v23 = vshrl.u32 %v4070_v9, 16 }
  0x15   : > { %667 = vst.msk [vmem:[#allocation5 + $0x1c] sm:$0xf] %vm293_vm0, %v4083_v18  ;;  %252 = vrot.lane.b32.xlu1 %v202_v16, %s4002_s18  ;;  %v194_v20 = vor.u32 %v192_v12, %v191_v14  ;;  %v207_v21 = vrot.slane %v205_v19, 7  ;;  %v213_v24 = vshrl.u32 %v4075_v13, 16  ;;  %v224_v26 = vshll.u32 %v4070_v9, 16  ;;  %s4012_s7 = smov 32  }
  0x16   : > { %244 = vrot.lane.b32.xlu0 %v186_v17, %s4002_s18  ;;  %v223_v25 = vrot.slane %v221_v23, 7  ;;  %v216_v27 = vshll.u32 %v4075_v13, 16  ;;  %v229_v30 = vshrl.u32 %v4079_v15, 16  ;;  %v232_v34 = vshll.u32 %v4079_v15, 16  ;;  %v3833_v51 = vld [vmem:[#allocation5 + $0x8] ss:$0 sps:$4 sm:$0xff]  }
  0x17   : > { %v210_v28 = vor.u32 %v208_v22, %v207_v21  ;;  %v215_v29 = vrot.slane %v213_v24, 7  ;;  %v187_v35 = vrot.slane %v183_v11, 4  ;;  %v237_v37 = vshrl.u32 %v4083_v18, 16  ;;  %v3830_v48 = vld [vmem:[#allocation5 + $0x4] ss:$0 sps:$4 sm:$0xff]  }
  0x18   : > { %v226_v31 = vor.u32 %v224_v26, %v223_v25  ;;  %v231_v33 = vrot.slane %v229_v30, 7  ;;  %v203_v38 = vrot.slane %v199_v10, 4  ;;  %v195_v39 = vrot.slane %v191_v14, 4  ;;  %v3831_v49 = vld [vmem:[#allocation5] ss:$0 sps:$4 sm:$0xff]  }
  0x19   : > { %485 = vrot.lane.b32.xlu1 %v186_v17, %s4003_s19  ;;  %v218_v32 = vor.u32 %v216_v27, %v215_v29  ;;  %v239_v40 = vrot.slane %v237_v37, 7  ;;  %v240_v41 = vshll.u32 %v4083_v18, 16  ;;  %v211_v43 = vrot.slane %v207_v21, 4  ;;  %v3832_v50 = vld [vmem:[#allocation5 + $0xc] ss:$0 sps:$4 sm:$0xff]  }
  0x1a   : > { %248 = vrot.lane.b32.xlu0 %v194_v20, %s4002_s18  ;;  %v234_v36 = vor.u32 %v232_v34, %v231_v33  ;;  %v219_v44 = vrot.slane %v215_v29, 4  ;;  %v235_v45 = vrot.slane %v231_v33, 4  ;;  %v227_v46 = vrot.slane %v223_v25, 4  ;;  %v545_v3 = vld [vmem:[#allocation4 + $0x10] sm:$0xf] }
  0x1b   : > { %v242_v42 = vor.u32 %v240_v41, %v239_v40  ;;  %v243_v47 = vrot.slane %v239_v40, 4  ;;  %v539_v4 = vld [vmem:[#allocation4 + $0x8] sm:$0xf]  ;;  %v317_v8 = vld [vmem:[#allocation2 + $0x20] sm:$0xf]  ;;  %vm1441_vm6 = vcmask 1041408  }
  0x1c   : > { %v551_v17 = vld [vmem:[#allocation4 + $0x18] sm:$0xf]  ;;  %vm1244_vm7 = vcmask 31744   ;;  %vm1269_vm8 = vcmask 64512   ;;  %vm1286_vm9 = vcmask 97280   ;;  %vm1303_vm10 = vcmask 130048  }
  0x1d   : > { %493 = vrot.lane.b32.xlu1 %v202_v16, %s4003_s19  ;;  %vm1320_vm11 = vcmask 162816   ;;  %vm1337_vm12 = vcmask 195584   ;;  %vm1354_vm13 = vcmask 228352   ;;  %vm1371_vm14 = vcmask 261120  }
  0x1e   : > { %489 = vrot.lane.b32.xlu0 %v194_v20, %s4003_s19  ;;  %vm1428_vm15 = vcmask 293888   ;;  %vm1789_vm3 = vsmask.f32 3328 }
  0x21   : > { %256 = vrot.lane.b32.xlu1 %v210_v28, %s4002_s18 }
  0x22   : > { %497 = vrot.lane.b32.xlu0 %v210_v28, %s4003_s19 }
  0x25   : > { %264 = vrot.lane.b32.xlu1 %v226_v31, %s4002_s18 }
  0x26   : > { %260 = vrot.lane.b32.xlu0 %v218_v32, %s4002_s18 }
  0x29   : > { %246 = vrot.lane.b32.xlu1 %v187_v35, %s4002_s18 }
  0x2a   : > { %268 = vrot.lane.b32.xlu0 %v234_v36, %s4002_s18 }
  0x2d   : > { %505 = vrot.lane.b32.xlu1 %v226_v31, %s4003_s19  ;;  %v329_v31 = vld [vmem:[#allocation2 + $0x30] sm:$0xf] }
  0x2e   : > { %501 = vrot.lane.b32.xlu0 %v218_v32, %s4003_s19  ;;  %v323_v32 = vld [vmem:[#allocation2 + $0x28] sm:$0xf] }
  0x31   : > { %254 = vrot.lane.b32.xlu1 %v203_v38, %s4002_s18 }
  0x32   : > { %250 = vrot.lane.b32.xlu0 %v195_v39, %s4002_s18 }
  0x35   : > { %513 = vrot.lane.b32.xlu1 %v242_v42, %s4003_s19 }
  0x36   : > { %509 = vrot.lane.b32.xlu0 %v234_v36, %s4003_s19 }
  0x39   : > { %491 = vrot.lane.b32.xlu1 %v195_v39, %s4003_s19 }
  0x3a   : > { %487 = vrot.lane.b32.xlu0 %v187_v35, %s4003_s19 }
  0x3d   : > { %495 = vrot.lane.b32.xlu1 %v203_v38, %s4003_s19  ;;  %v302_v38 = vld [vmem:[#allocation2 + $0xc] sm:$0x1] }
  0x3e   : > { %272 = vrot.lane.b32.xlu0 %v242_v42, %s4002_s18 }
  0x41   : > { %450 = vrot.lane.b32.xlu1 %v4051_v1, %s4004_s20 }
  0x42   : > { %499 = vrot.lane.b32.xlu0 %v211_v43, %s4003_s19 }
  0x45   : > { %452 = vrot.lane.b32.xlu1 %v4053_v2, %s4004_s20 }
  0x46   : > { %258 = vrot.lane.b32.xlu0 %v211_v43, %s4002_s18 }
  0x49   : > { %262 = vrot.lane.b32.xlu1 %v219_v44, %s4002_s18 }
  0x4a   : > { %454 = vrot.lane.b32.xlu0 %v4049_v0, %s4004_s20 }
  0x4d   : > { %270 = vrot.lane.b32.xlu1 %v235_v45, %s4002_s18 }
  0x4e   : > { %266 = vrot.lane.b32.xlu0 %v227_v46, %s4002_s18 }
  0x51   : > { %507 = vrot.lane.b32.xlu1 %v227_v46, %s4003_s19  ;;  %v350_v46 = vld [vmem:[#allocation2 + $0x4] sm:$0x1] }
  0x52   : > { %503 = vrot.lane.b32.xlu0 %v219_v44, %s4003_s19 }
  0x55   : > { %515 = vrot.lane.b32.xlu1 %v243_v47, %s4003_s19 }
  0x56   : > { %511 = vrot.lane.b32.xlu0 %v235_v45, %s4003_s19 }
  0x59   : > { %458 = vrot.lane.b32.xlu1 %v4075_v13, %s4004_s20 }
  0x5a   : > { %456 = vrot.lane.b32.xlu0 %v4065_v7, %s4004_s20 }
  0x5d   : > { %460 = vrot.lane.b32.xlu1 %v4070_v9, %s4004_s20 }
  0x5e   : > { %274 = vrot.lane.b32.xlu0 %v243_v47, %s4002_s18  ;;  %v335_v47 = vld [vmem:[#allocation2 + $0x38] sm:$0xf] }
  0x61   : > { %464 = vrot.lane.b32.xlu1 %v4083_v18, %s4004_s20 }
  0x62   : > { %462 = vrot.lane.b32.xlu0 %v4079_v15, %s4004_s20 }
  0x65   : > { %958 = vrot.lane.b32.xlu1 %v3830_v48, %s4005_s21 }
  0x66   : > { %956 = vrot.lane.b32.xlu0 %v3831_v49, %s4005_s21 }
  0x69   : > { %962 = vrot.lane.b32.xlu1 %v3832_v50, %s4005_s21 }
  0x6a   : > { %960 = vrot.lane.b32.xlu0 %v3833_v51, %s4005_s21 }
  0x87   : > { %v253_v56 = vpop.permute.xlu1 %252 }
  0x88   : > { %v245_v57 = vpop.permute.xlu0 %244  ;;  %v312_v58 = vsel %vm4143_vm2, %v253_v56, %v311_v53 }
  0x89   : > { %v297_v59 = vsel %vm4143_vm2, %v245_v57, %v296_v54  ;;  %v348_v60 = vsel %vm4143_vm2, %v245_v57, %v347_v55  ;;  %313 = vst [vmem:[#allocation2 + $0x18] sm:$0xf] %v312_v58 }
  0x8a   : > { %298 = vst [vmem:[#allocation2 + $0x8] sm:$0xf] %v297_v59  ;;  %349 = vst [vmem:[#allocation2] sm:$0xf] %v348_v60 }
  0x8b   : > { %v486_v63 = vpop.permute.xlu1 %485 }
  0x8c   : > { %v249_v0 = vpop.permute.xlu0 %248  ;;  %v534_v1 = vsel %vm4143_vm2, %v486_v63, %v533_v61  ;;  %v557_v63 = vld [vmem:[#allocation4 + $0x20] sm:$0xf] }
  0x8d   : > { %v306_v2 = vsel %vm4143_vm2, %v249_v0, %v305_v62  ;;  %535 = vst [vmem:[#allocation4] sm:$0xf] %v534_v1  ;;  %v563_v62 = vld [vmem:[#allocation4 + $0x28] sm:$0xf] }
  0x8e   : > { %307 = vst [vmem:[#allocation2 + $0x10] sm:$0xf] %v306_v2 }
  0x8f   : > { %v494_v6 = vpop.permute.xlu1 %493 }
  0x90   : > { %v490_v7 = vpop.permute.xlu0 %489  ;;  %v356_v9 = vld [vmem:[#allocation2 + $0x18] sm:$0x1]  ;;  %v546_v12 = vsel %vm4143_vm2, %v494_v6, %v545_v3 }
  0x91   : > { %v424_v10 = vld [vmem:[#allocation2 + $0x18] sm:$0x1]  ;;  %v353_v11 = vld [vmem:[#allocation2] sm:$0x1]  ;;  %v540_v13 = vsel %vm4143_vm2, %v490_v7, %v539_v4  ;;  %v378_v14 = vshrl.u32 %v356_v9, 16 }
  0x92   : > { %v354_v15 = vld [vmem:[#allocation2 + $0x8] sm:$0x1]  ;;  %v363_v16 = vshrl.u32 %v353_v11, 16  ;;  %547 = vst [vmem:[#allocation4 + $0x10] sm:$0xf] %v546_v12 }
  0x93   : > { %541 = vst [vmem:[#allocation4 + $0x8] sm:$0xf] %v540_v13  ;;  %v368_v18 = vshrl.u32 %v354_v15, 16  ;;  %v425_v19 = vsel %vm4158_vm5, %v378_v14, %v424_v10  ;;  %v418_v21 = vld [vmem:[#allocation2 + $0x8] sm:$0x1]  ;;  %v257_v22 = vpop.permute.xlu1 %256 }
  0x94   : > { %v416_v20 = vsel %vm4158_vm5, %v363_v16, %v353_v11  ;;  %v498_v23 = vpop.permute.xlu0 %497  ;;  %426 = vst [vmem:[#allocation2 + $0x18] sm:$0x1] %v425_v19  ;;  %v581_v25 = vld [vmem:[#allocation4] sm:$0x1]  ;;  %v318_v27 = vsel %vm4143_vm2, %v257_v22, %v317_v8  ;;  %v314_v13 = vld [vmem:[#allocation2 + $0x1c] sm:$0x1] }
  0x95   : > { %417 = vst [vmem:[#allocation2] sm:$0x1] %v416_v20  ;;  %v419_v24 = vsel %vm4158_vm5, %v368_v18, %v418_v21  ;;  %v355_v26 = vld [vmem:[#allocation2 + $0x10] sm:$0x1]  ;;  %v552_v28 = vsel %vm4143_vm2, %v498_v23, %v551_v17  ;;  %v590_v29 = vshrl.u32 %v581_v25, 16 }
  0x96   : > { %420 = vst [vmem:[#allocation2 + $0x8] sm:$0x1] %v419_v24  ;;  %v373_v30 = vshrl.u32 %v355_v26, 16  ;;  %319 = vst [vmem:[#allocation2 + $0x20] sm:$0xf] %v318_v27 }
  0x97   : > { %553 = vst [vmem:[#allocation4 + $0x18] sm:$0xf] %v552_v28  ;;  %v421_v33 = vld [vmem:[#allocation2 + $0x10] sm:$0x1]  ;;  %v637_v34 = vsel %vm4158_vm5, %v590_v29, %v581_v25  ;;  %v265_v36 = vpop.permute.xlu1 %264  ;;  %v308_v14 = vld [vmem:[#allocation2 + $0x14] sm:$0x1] }
  0x98   : > { %v422_v35 = vsel %vm4158_vm5, %v373_v30, %v421_v33  ;;  %v261_v37 = vpop.permute.xlu0 %260  ;;  %638 = vst [vmem:[#allocation4] sm:$0x1] %v637_v34  ;;  %v330_v42 = vsel %vm4143_vm2, %v265_v36, %v329_v31  ;;  %v575_v24 = vld [vmem:[#allocation4 + $0x38] sm:$0xf]  ;;  %v569_v25 = vld [vmem:[#allocation4 + $0x30] sm:$0xf] }
  0x99   : > { %423 = vst [vmem:[#allocation2 + $0x10] sm:$0x1] %v422_v35  ;;  %v583_v39 = vld [vmem:[#allocation4 + $0x10] sm:$0x1]  ;;  %v324_v43 = vsel %vm4143_vm2, %v261_v37, %v323_v32  ;;  %331 = vst [vmem:[#allocation2 + $0x30] sm:$0xf] %v330_v42 }
  0x9a   : > { %v642_v40 = vld [vmem:[#allocation4 + $0x10] sm:$0x1]  ;;  %v582_v41 = vld [vmem:[#allocation4 + $0x8] sm:$0x1]  ;;  %v600_v44 = vshrl.u32 %v583_v39, 16 }
  0x9b   : > { %v595_v45 = vshrl.u32 %v582_v41, 16  ;;  %325 = vst [vmem:[#allocation2 + $0x28] sm:$0xf] %v324_v43  ;;  %v639_v48 = vld [vmem:[#allocation4 + $0x8] sm:$0x1]  ;;  %v247_v51 = vpop.permute.xlu1 %246 }
  0x9c   : > { %v643_v49 = vsel %vm4158_vm5, %v600_v44, %v642_v40  ;;  %v269_v53 = vpop.permute.xlu0 %268  ;;  %v303_v57 = vsel %vm4158_vm5, %v247_v51, %v302_v38  ;;  %v351_v58 = vsel %vm4158_vm5, %v247_v51, %v350_v46  ;;  %v542_v37 = vld [vmem:[#allocation4 + $0xc] sm:$0x1]  ;;  %v536_v38 = vld [vmem:[#allocation4 + $0x4] sm:$0x1]  ;;  %v548_v46 = vld [vmem:[#allocation4 + $0x14] sm:$0x1] }
  0x9d   : > { %v640_v50 = vsel %vm4158_vm5, %v595_v45, %v639_v48  ;;  %644 = vst [vmem:[#allocation4 + $0x10] sm:$0x1] %v643_v49  ;;  %v357_v54 = vld [vmem:[#allocation2 + $0x20] sm:$0x1]  ;;  %v336_v59 = vsel %vm4143_vm2, %v269_v53, %v335_v47  ;;  %304 = vst [vmem:[#allocation2 + $0xc] sm:$0x1] %v303_v57 }
  0x9e   : > { %641 = vst [vmem:[#allocation4 + $0x8] sm:$0x1] %v640_v50  ;;  %v427_v55 = vld [vmem:[#allocation2 + $0x20] sm:$0x1]  ;;  %v584_v56 = vld [vmem:[#allocation4 + $0x18] sm:$0x1] }
  0x9f   : > { %v383_v60 = vshrl.u32 %v357_v54, 16  ;;  %v605_v61 = vshrl.u32 %v584_v56, 16  ;;  %352 = vst [vmem:[#allocation2 + $0x4] sm:$0x1] %v351_v58  ;;  %337 = vst [vmem:[#allocation2 + $0x38] sm:$0xf] %v336_v59  ;;  %v506_v3 = vpop.permute.xlu1 %505 }
  0xa0   : > { %v645_v0 = vld [vmem:[#allocation4 + $0x18] sm:$0x1]  ;;  %v502_v4 = vpop.permute.xlu0 %501  ;;  %v359_v6 = vld [vmem:[#allocation2 + $0x30] sm:$0x1]  ;;  %v564_v9 = vsel %vm4143_vm2, %v506_v3, %v563_v62  ;;  %v341_v47 = vld [vmem:[#allocation2 + $0x40] sm:$0xf] }
  0xa1   : > { %v428_v1 = vsel %vm4158_vm5, %v383_v60, %v427_v55  ;;  %v646_v2 = vsel %vm4158_vm5, %v605_v61, %v645_v0  ;;  %v433_v7 = vld [vmem:[#allocation2 + $0x30] sm:$0x1]  ;;  %v558_v10 = vsel %vm4143_vm2, %v502_v4, %v557_v63  ;;  %v393_v11 = vshrl.u32 %v359_v6, 16  ;;  %565 = vst [vmem:[#allocation4 + $0x28] sm:$0xf] %v564_v9 }
  0xa2   : > { %429 = vst [vmem:[#allocation2 + $0x20] sm:$0x1] %v428_v1  ;;  %647 = vst [vmem:[#allocation4 + $0x18] sm:$0x1] %v646_v2  ;;  %v358_v8 = vld [vmem:[#allocation2 + $0x28] sm:$0x1] }
  0xa3   : > { %v388_v12 = vshrl.u32 %v358_v8, 16  ;;  %559 = vst [vmem:[#allocation4 + $0x20] sm:$0xf] %v558_v10  ;;  %v430_v15 = vld [vmem:[#allocation2 + $0x28] sm:$0x1]  ;;  %v434_v16 = vsel %vm4158_vm5, %v393_v11, %v433_v7  ;;  %v255_v18 = vpop.permute.xlu1 %254 }
  0xa4   : > { %v251_v19 = vpop.permute.xlu0 %250  ;;  %435 = vst [vmem:[#allocation2 + $0x30] sm:$0x1] %v434_v16  ;;  %v315_v21 = vsel %vm4158_vm5, %v255_v18, %v314_v13  ;;  %v554_v58 = vld [vmem:[#allocation4 + $0x1c] sm:$0x1]  ;;  %v320_v0 = vld [vmem:[#allocation2 + $0x24] sm:$0x1] }
  0xa5   : > { %v431_v17 = vsel %vm4158_vm5, %v388_v12, %v430_v15  ;;  %v309_v22 = vsel %vm4158_vm5, %v251_v19, %v308_v14  ;;  %316 = vst [vmem:[#allocation2 + $0x1c] sm:$0x1] %v315_v21  ;;  %v326_v7 = vld [vmem:[#allocation2 + $0x2c] sm:$0x1]  ;;  %v338_v15 = vld [vmem:[#allocation2 + $0x3c] sm:$0x1] }
  0xa6   : > { %432 = vst [vmem:[#allocation2 + $0x28] sm:$0x1] %v431_v17  ;;  %v360_v20 = vld [vmem:[#allocation2 + $0x38] sm:$0x1]  ;;  %310 = vst [vmem:[#allocation2 + $0x14] sm:$0x1] %v309_v22 }
  0xa7   : > { %v398_v23 = vshrl.u32 %v360_v20, 16  ;;  %v436_v26 = vld [vmem:[#allocation2 + $0x38] sm:$0x1]  ;;  %v514_v28 = vpop.permute.xlu1 %513  ;;  %v332_v16 = vld [vmem:[#allocation2 + $0x34] sm:$0x1] }
  0xa8   : > { %v510_v29 = vpop.permute.xlu0 %509  ;;  %v586_v30 = vld [vmem:[#allocation4 + $0x28] sm:$0x1]  ;;  %v576_v33 = vsel %vm4143_vm2, %v514_v28, %v575_v24  ;;  %v566_v22 = vld [vmem:[#allocation4 + $0x2c] sm:$0x1] }
  0xa9   : > { %v437_v27 = vsel %vm4158_vm5, %v398_v23, %v436_v26  ;;  %v651_v31 = vld [vmem:[#allocation4 + $0x28] sm:$0x1]  ;;  %v570_v34 = vsel %vm4143_vm2, %v510_v29, %v569_v25  ;;  %v615_v35 = vshrl.u32 %v586_v30, 16  ;;  %577 = vst [vmem:[#allocation4 + $0x38] sm:$0xf] %v576_v33 }
  0xaa   : > { %438 = vst [vmem:[#allocation2 + $0x38] sm:$0x1] %v437_v27  ;;  %v585_v32 = vld [vmem:[#allocation4 + $0x20] sm:$0x1]  ;;  %571 = vst [vmem:[#allocation4 + $0x30] sm:$0xf] %v570_v34 }
  0xab   : > { %v610_v36 = vshrl.u32 %v585_v32, 16  ;;  %v648_v39 = vld [vmem:[#allocation4 + $0x20] sm:$0x1]  ;;  %v652_v40 = vsel %vm4158_vm5, %v615_v35, %v651_v31  ;;  %v492_v42 = vpop.permute.xlu1 %491  ;;  %v560_v23 = vld [vmem:[#allocation4 + $0x24] sm:$0x1] }
  0xac   : > { %v488_v43 = vpop.permute.xlu0 %487  ;;  %653 = vst [vmem:[#allocation4 + $0x28] sm:$0x1] %v652_v40  ;;  %v543_v44 = vsel %vm4158_vm5, %v492_v42, %v542_v37  ;;  %v578_v30 = vld [vmem:[#allocation4 + $0x3c] sm:$0x1]  ;;  %v572_v31 = vld [vmem:[#allocation4 + $0x34] sm:$0x1] }
  0xad   : > { %v649_v41 = vsel %vm4158_vm5, %v610_v36, %v648_v39  ;;  %v537_v45 = vsel %vm4158_vm5, %v488_v43, %v536_v38  ;;  %544 = vst [vmem:[#allocation4 + $0xc] sm:$0x1] %v543_v44  ;;  %v344_v40 = vld [vmem:[#allocation2 + $0x44] sm:$0x1] }
  0xae   : > { %650 = vst [vmem:[#allocation4 + $0x20] sm:$0x1] %v649_v41  ;;  %538 = vst [vmem:[#allocation4 + $0x4] sm:$0x1] %v537_v45 }
  0xaf   : > { %v496_v48 = vpop.permute.xlu1 %495 }
  0xb0   : > { %v273_v49 = vpop.permute.xlu0 %272  ;;  %v588_v50 = vld [vmem:[#allocation4 + $0x38] sm:$0x1]  ;;  %v549_v54 = vsel %vm4158_vm5, %v496_v48, %v548_v46 }
  0xb1   : > { %v657_v51 = vld [vmem:[#allocation4 + $0x38] sm:$0x1]  ;;  %v587_v53 = vld [vmem:[#allocation4 + $0x30] sm:$0x1]  ;;  %v342_v55 = vsel %vm4143_vm2, %v273_v49, %v341_v47  ;;  %v625_v56 = vshrl.u32 %v588_v50, 16  ;;  %vm1731_vm2 = vcmask 1040384  }
  0xb2   : > { %v620_v57 = vshrl.u32 %v587_v53, 16  ;;  %550 = vst [vmem:[#allocation4 + $0x14] sm:$0x1] %v549_v54  ;;  %343 = vst [vmem:[#allocation2 + $0x40] sm:$0xf] %v342_v55 }
  0xb3   : > { %v654_v59 = vld [vmem:[#allocation4 + $0x30] sm:$0x1]  ;;  %v658_v60 = vsel %vm4158_vm5, %v625_v56, %v657_v51  ;;  %v451_v62 = vpop.permute.xlu1 %450  ;;  %v692_v50 = vld [vmem:[#allocation4] sm:$0xf]  ;;  %v693_v53 = vld [vmem:[#allocation4 + $0x8] sm:$0xf] }
  0xb4   : > { %v655_v61 = vsel %vm4158_vm5, %v620_v57, %v654_v59  ;;  %v500_v63 = vpop.permute.xlu0 %499  ;;  %659 = vst [vmem:[#allocation4 + $0x38] sm:$0x1] %v658_v60  ;;  %476 = vst.msk [vmem:[#allocation3 + $0x4] sm:$0xf] %vm293_vm0, %v451_v62  ;;  %v3255_v51 = vcombine.low %v692_v50, %v692_v50  ;;  %v694_v54 = vld [vmem:[#allocation4 + $0x10] sm:$0xf]  ;;  %v3256_v56 = vcombine.low %v693_v53, %v693_v53 }
  0xb5   : > { %656 = vst [vmem:[#allocation4 + $0x30] sm:$0x1] %v655_v61  ;;  %484 = vst.msk [vmem:[#allocation3] sm:$0xf] %vm293_vm0, %v451_v62  ;;  %v555_v52 = vsel %vm4158_vm5, %v500_v63, %v554_v58  ;;  %v684_v55 = vld [vmem:[#allocation2 + $0x4] sm:$0x1]  ;;  %v3257_v58 = vcombine.low %v694_v54, %v694_v54 }
  0xb6   : > { %556 = vst [vmem:[#allocation4 + $0x1c] sm:$0x1] %v555_v52  ;;  %v4276_v57 = vld [vmem:[#allocation2] sm:$0xf]  ;;  %v695_v59 = vld [vmem:[#allocation4 + $0x18] sm:$0xf] }
  0xb7   : > { %v453_v1 = vpop.permute.xlu1 %452  ;;  %v3247_v60 = vcombine.low %v4276_v57, %v684_v55  ;;  %v685_v61 = vld [vmem:[#allocation2 + $0xc] sm:$0x1]  ;;  %v716_v62 = vld [vmem:[#allocation2 + $0x8] sm:$0xf]  ;;  %v686_v63 = vld [vmem:[#allocation2 + $0x14] sm:$0x1] }
  0xb8   : > { %v259_v2 = vpop.permute.xlu0 %258  ;;  %477 = vst.msk [vmem:[#allocation3 + $0x8] sm:$0xf] %vm293_vm0, %v453_v1  ;;  %v4281_v52 = vld [vmem:[#allocation2 + $0x8] sm:$0xf]  ;;  %v4283_v1 = vld [vmem:[#allocation2 + $0x10] sm:$0xf] }
  0xb9   : > { %v361_v3 = vld [vmem:[#allocation2 + $0x40] sm:$0x1]  ;;  %v321_v4 = vsel %vm4158_vm5, %v259_v2, %v320_v0  ;;  %v3258_v0 = vcombine.low %v695_v59, %v695_v59  ;;  %v3248_v2 = vcombine.low %v4281_v52, %v685_v61 }
  0xba   : > { %v403_v6 = vshrl.u32 %v361_v3, 16  ;;  %322 = vst [vmem:[#allocation2 + $0x24] sm:$0x1] %v321_v4  ;;  %v439_v8 = vld [vmem:[#allocation2 + $0x40] sm:$0x1]  ;;  %v3279_v3 = vcombine.low %v716_v62, %v716_v62 }
  0xbb   : > { %v263_v10 = vpop.permute.xlu1 %262  ;;  %v3834_v12 = vld [vmem:[#allocation3 + $0x4] ss:$0 sps:$4 sm:$0xff]   ;;  %v717_v4 = vld [vmem:[#allocation2 + $0x10] sm:$0xf] }
  0xbc   : > { %v440_v9 = vsel %vm4158_vm5, %v403_v6, %v439_v8  ;;  %v455_v11 = vpop.permute.xlu0 %454  ;;  %v327_v13 = vsel %vm4158_vm5, %v263_v10, %v326_v7  ;;  %v3835_v14 = vld [vmem:[#allocation3] ss:$0 sps:$4 sm:$0xff]   ;;  %766 = vrot.lane.b32.xlu1 %v3834_v12, %s4006_s22  ;;  %v3837_v29 = vld [vmem:[#allocation3 + $0x4] ss:$0 sps:$4 sm:$0xff]   ;;  %v823_v6 = vshll.u32 %v3247_v60, 16  ;;  %v3249_v7 = vcombine.low %v4283_v1, %v686_v63 }
  0xbd   : > { %441 = vst [vmem:[#allocation2 + $0x40] sm:$0x1] %v440_v9  ;;  %478 = vst.msk [vmem:[#allocation3 + $0xc] sm:$0xf] %vm293_vm0, %v455_v11  ;;  %764 = vrot.lane.b32.xlu0 %v3835_v14, %s4006_s22  ;;  %v687_v8 = vld [vmem:[#allocation2 + $0x1c] sm:$0x1]  ;;  %v3280_v12 = vcombine.low %v717_v4, %v717_v4 }
  0xbe   : > { %328 = vst [vmem:[#allocation2 + $0x2c] sm:$0x1] %v327_v13  ;;  %v708_v9 = vld [vmem:[#allocation4 + $0x4] sm:$0x1]  ;;  %v718_v10 = vld [vmem:[#allocation2 + $0x18] sm:$0xf] }
  0xbf   : > { %v271_v17 = vpop.permute.xlu1 %270  ;;  %v3836_v19 = vld [vmem:[#allocation3 + $0x8] ss:$0 sps:$4 sm:$0xff]   ;;  %v4289_v11 = vld [vmem:[#allocation2 + $0x18] sm:$0xf]  ;;  %v830_v13 = vshll.u32 %v3248_v2, 16 }
  0xc0   : > { %v267_v18 = vpop.permute.xlu0 %266  ;;  %v339_v20 = vsel %vm4158_vm5, %v271_v17, %v338_v15  ;;  %v3840_v34 = vld [vmem:[#allocation3 + $0x8] ss:$0 sps:$4 sm:$0xff]   ;;  %v3250_v14 = vcombine.low %v4289_v11, %v687_v8  ;;  %v3271_v15 = vcombine.low %v692_v50, %v708_v9  ;;  %v3281_v17 = vcombine.low %v718_v10, %v718_v10 }
  0xc1   : > { %v333_v21 = vsel %vm4158_vm5, %v267_v18, %v332_v16  ;;  %340 = vst [vmem:[#allocation2 + $0x3c] sm:$0x1] %v339_v20  ;;  %768 = vrot.lane.b32.xlu0 %v3836_v19, %s4006_s22  ;;  %v709_v16 = vld [vmem:[#allocation4 + $0xc] sm:$0x1]  ;;  %v825_v18 = vrot.slane %v823_v6, 1  ;;  %v837_v20 = vshll.u32 %v3249_v7, 16 }
  0xc2   : > { %334 = vst [vmem:[#allocation2 + $0x34] sm:$0x1] %v333_v21  ;;  %v719_v19 = vld [vmem:[#allocation2 + $0x20] sm:$0xf]  ;;  %v735_v55 = vld [vmem:[#allocation2 + $0x24] sm:$0x1] }
  0xc3   : > { %v508_v24 = vpop.permute.xlu1 %507  ;;  %v710_v21 = vld [vmem:[#allocation4 + $0x14] sm:$0x1]  ;;  %v688_v61 = vld [vmem:[#allocation2 + $0x24] sm:$0x1] }
  0xc4   : > { %v504_v25 = vpop.permute.xlu0 %503  ;;  %v3838_v26 = vld [vmem:[#allocation3 + $0xc] ss:$0 sps:$4 sm:$0xff]   ;;  %v567_v27 = vsel %vm4158_vm5, %v508_v24, %v566_v22  ;;  %v821_v22 = vshrl.u32 %v3247_v60, 16  ;;  %v3282_v24 = vcombine.low %v719_v19, %v719_v19  ;;  %v4309_v6 = vld [vmem:[#allocation2 + $0x20] sm:$0xf] }
  0xc5   : > { %v561_v28 = vsel %vm4158_vm5, %v504_v25, %v560_v23  ;;  %568 = vst [vmem:[#allocation4 + $0x2c] sm:$0x1] %v567_v27  ;;  %770 = vrot.lane.b32.xlu1 %v3838_v26, %s4006_s22  ;;  %1132 = vrot.lane.b32.xlu0 %v3837_v29, %s4007_s23  ;;  %v3839_v37 = vld [vmem:[#allocation3 + $0xc] ss:$0 sps:$4 sm:$0xff]   ;;  %v3272_v23 = vcombine.low %v693_v53, %v709_v16  ;;  %v832_v25 = vrot.slane %v830_v13, 1  ;;  %v844_v26 = vshll.u32 %v3250_v14, 16 }
  0xc6   : > { %562 = vst [vmem:[#allocation4 + $0x24] sm:$0x1] %v561_v28  ;;  %v3273_v27 = vcombine.low %v694_v54, %v710_v21  ;;  %v711_v28 = vld [vmem:[#allocation4 + $0x1c] sm:$0x1]  ;;  %v826_v29 = vor.u32 %v825_v18, %v821_v22 }
  0xc7   : > { %v516_v32 = vpop.permute.xlu1 %515  ;;  %v1004_v60 = vshrl.u32 %v3272_v23, 16  ;;  %v4314_v16 = vld [vmem:[#allocation2 + $0x28] sm:$0xf] }
  0xc8   : > { %v512_v33 = vpop.permute.xlu0 %511  ;;  %v579_v35 = vsel %vm4158_vm5, %v516_v32, %v578_v30  ;;  %v839_v30 = vrot.slane %v837_v20, 1  ;;  %v732_v32 = vld [vmem:[#allocation2 + $0xc] sm:$0x1]  ;;  %v1011_v63 = vshrl.u32 %v3273_v27, 16  ;;  %v4316_v20 = vld [vmem:[#allocation2 + $0x30] sm:$0xf] }
  0xc9   : > { %v573_v36 = vsel %vm4158_vm5, %v512_v33, %v572_v31  ;;  %580 = vst [vmem:[#allocation4 + $0x3c] sm:$0x1] %v579_v35  ;;  %1134 = vrot.lane.b32.xlu1 %v3840_v34, %s4007_s23  ;;  %1136 = vrot.lane.b32.xlu0 %v3839_v37, %s4007_s23  ;;  %v999_v31 = vshll.u32 %v3271_v15, 16  ;;  %v828_v33 = vshrl.u32 %v3248_v2, 16  ;;  %v835_v34 = vshrl.u32 %v3249_v7, 16 }
  0xca   : > { %574 = vst [vmem:[#allocation4 + $0x34] sm:$0x1] %v573_v36  ;;  %v3894_v35 = vld [vmem:[%s4999_s1 + $0x10] ss:$0 sps:$4 sm:$0x33]   ;;  %v3274_v36 = vcombine.low %v695_v59, %v711_v28 }
  0xcb   : > { %v459_v38 = vpop.permute.xlu1 %458  ;;  %v833_v37 = vor.u32 %v832_v25, %v828_v33  ;;  %3810 = vmatprep.subr.msk.bf16.mxu0 %vm1441_vm6, %v3894_v35 }
  0xcc   : > { %v457_v39 = vpop.permute.xlu0 %456  ;;  %480 = vst.msk [vmem:[#allocation3 + $0x14] sm:$0xf] %vm293_vm0, %v459_v38  ;;  %v846_v38 = vrot.slane %v844_v26, 1  ;;  %v1020_v53 = vshll.u32 %v3274_v36, 16  ;;  %v1018_v13 = vshrl.u32 %v3274_v36, 16 }
  0xcd   : > { %479 = vst.msk [vmem:[#allocation3 + $0x10] sm:$0xf] %vm293_vm0, %v457_v39  ;;  %v1006_v39 = vshll.u32 %v3272_v23, 16  ;;  %v691_v26 = vld [vmem:[#allocation2 + $0x3c] sm:$0x1] }
  0xcf   : > { %v461_v41 = vpop.permute.xlu1 %460 }
  0xd0   : > { %v275_v42 = vpop.permute.xlu0 %274  ;;  %481 = vst.msk [vmem:[#allocation3 + $0x18] sm:$0xf] %vm293_vm0, %v461_v41  ;;  %v733_v41 = vld [vmem:[#allocation2 + $0x14] sm:$0x1] }
  0xd1   : > { %v345_v43 = vsel %vm4158_vm5, %v275_v42, %v344_v40  ;;  %v3295_v40 = vcombine.low %v716_v62, %v732_v32  ;;  %v840_v42 = vor.u32 %v839_v30, %v835_v34  ;;  %v3296_v50 = vcombine.low %v717_v4, %v733_v41  ;;  %v3896_v62 = vld [vmem:[%s4999_s1] sm:$0xff]  }
  0xd2   : > { %346 = vst [vmem:[#allocation2 + $0x44] sm:$0x1] %v345_v43  ;;  %v1001_v43 = vrot.slane %v999_v31, 1 }
  0xd3   : > { %v465_v46 = vpop.permute.xlu1 %464  ;;  %v3843_v48 = vld [vmem:[#allocation3 + $0x14] ss:$0 sps:$4 sm:$0xff]   ;;  %v1175_v59 = vshll.u32 %v3295_v40, 16  ;;  %v1182_v4 = vshll.u32 %v3296_v50, 16 }
  0xd4   : > { %v463_v44 = vpop.permute.xlu0 %462  ;;  %v3841_v45 = vld [vmem:[#allocation3 + $0x10] ss:$0 sps:$4 sm:$0xff]   ;;  %483 = vst.msk [vmem:[#allocation3 + $0x20] sm:$0xf] %vm293_vm0, %v465_v46  ;;  %v842_v46 = vshrl.u32 %v3250_v14, 16 }
  0xd5   : > { %482 = vst.msk [vmem:[#allocation3 + $0x1c] sm:$0xf] %vm293_vm0, %v463_v44  ;;  %v3842_v47 = vld [vmem:[#allocation3 + $0x10] ss:$0 sps:$4 sm:$0xff]   ;;  %1138 = vrot.lane.b32.xlu1 %v3841_v45, %s4007_s23  ;;  %v1013_v44 = vshll.u32 %v3273_v27, 16  ;;  %v1177_v8 = vrot.slane %v1175_v59, 1 }
  0xd6   : > { %772 = vrot.lane.b32.xlu0 %v3842_v47, %s4006_s22  ;;  %v734_v45 = vld [vmem:[#allocation2 + $0x1c] sm:$0x1]  ;;  %v1443_v47 = vsel %vm1441_vm6, %v3894_v35, 0  ;;  %v690_v14 = vld [vmem:[#allocation2 + $0x34] sm:$0x1]  ;;  %v1184_v18 = vrot.slane %v1182_v4, 1 }
  0xd7   : > { %v3844_v49 = vld [vmem:[#allocation3 + $0x18] ss:$0 sps:$4 sm:$0xff]   ;;  %3725 = vmatpush3.bf16.msra.mxu0 %v1443_v47  ;;  %v3297_v54 = vcombine.low %v718_v10, %v734_v45  ;;  %v3251_v10 = vcombine.low %v4309_v6, %v688_v61  ;;  %v3253_v25 = vcombine.low %v4316_v20, %v690_v14  ;;  %v1180_v27 = vshrl.u32 %v3296_v50, 16  ;;  %v699_v61 = vld [vmem:[#allocation4 + $0x38] sm:$0xf] }
  0xd8   : > { %v715_v4 = vld [vmem:[#allocation4 + $0x3c] sm:$0x1]  ;;  %vm1681_vm0 = vcmask 1043456   ;;  %vm1823_vm6 = vcmask 1043459  }
  0xd9   : > { %774 = vrot.lane.b32.xlu1 %v3843_v48, %s4006_s22  ;;  %v3895_v48 = vld [vmem:[%s4999_s1 + $0x8] sm:$0xff]   ;;  %v1189_v9 = vshll.u32 %v3297_v54, 16  ;;  %v1187_v28 = vshrl.u32 %v3297_v54, 16  ;;  %v1185_v30 = vor.u32 %v1184_v18, %v1180_v27  ;;  %v865_v36 = vshll.u32 %v3253_v25, 16  ;;  %vm4561_vm5 = vmand %vm1681_vm0, %vm294_vm1 }
  0xda   : > { %776 = vrot.lane.b32.xlu0 %v3844_v49, %s4006_s22  ;;  %v997_v49 = vshrl.u32 %v3271_v15, 16  ;;  %3726 = vmatprep.subr.bf16.mxu0 %v3895_v48  ;;  %v1173_v15 = vshrl.u32 %v3295_v40, 16  ;;  %v863_v45 = vshrl.u32 %v3253_v25, 16  ;;  %v712_v54 = vld [vmem:[#allocation4 + $0x24] sm:$0x1]  ;;  %vm4577_vm1 = vmand %vm1681_vm0, %vm1789_vm3 }
  0xdb   : > { %3727 = vmatpush3.bf16.msra.mxu0 %v3895_v48  ;;  %v1191_v23 = vrot.slane %v1189_v9, 1  ;;  %v3879_v9 = vld [vmem:[#allocation5 + $0x18] ss:$0 sps:$4 sm:$0xff]  }
  0xdc   : > { %v3847_v5 = vld [vmem:[#allocation3 + $0x1c] ss:$0 sps:$4 sm:$0xff]   ;;  %3728 = vmatprep.subr.bf16.mxu0 %v3896_v62  ;;  %v1178_v22 = vor.u32 %v1177_v8, %v1173_v15  ;;  %v3880_v8 = vld [vmem:[#allocation5 + $0x14] ss:$0 sps:$4 sm:$0xff]   ;;  %v3881_v15 = vld [vmem:[#allocation5 + $0x1c] ss:$0 sps:$4 sm:$0xff]  }
  0xdd   : > { %778 = vrot.lane.b32.xlu1 %v3847_v5, %s4006_s22  ;;  %v847_v5 = vor.u32 %v846_v38, %v842_v46  ;;  %v1192_v34 = vor.u32 %v1191_v23, %v1187_v28  ;;  %v849_v38 = vshrl.u32 %v3251_v10, 16  ;;  %v720_v28 = vld [vmem:[#allocation2 + $0x28] sm:$0xf] }
  0xde   : > { %916 = vrot.lane.b32.xlu0 %v3255_v51, %s4008_s24  ;;  %v1008_v51 = vrot.slane %v1006_v39, 1 }
  0xdf   : > { %3729 = vmatpush3.bf16.msra.mxu0 %v3896_v62  ;;  %v714_v62 = vld [vmem:[#allocation4 + $0x34] sm:$0x1] }
  0xe0   : > { %v1009_v2 = vor.u32 %v1008_v51, %v1004_v60  ;;  %v713_v60 = vld [vmem:[#allocation4 + $0x2c] sm:$0x1] }
  0xe1   : > { %918 = vrot.lane.b32.xlu1 %v3256_v56, %s4008_s24  ;;  %v1002_v56 = vor.u32 %v1001_v43, %v997_v49  ;;  %v867_v43 = vrot.slane %v865_v36, 1  ;;  %v696_v49 = vld [vmem:[#allocation4 + $0x20] sm:$0xf]  ;;  %v4345_v36 = vpop.permute.xlu0 %956 }
  0xe2   : > { %920 = vrot.lane.b32.xlu0 %v3257_v58, %s4008_s24  ;;  %v1015_v58 = vrot.slane %v1013_v44, 1  ;;  %v3259_v51 = vcombine.low %v696_v49, %v696_v49 }
  0xe3   : > { %v868_v48 = vor.u32 %v867_v43, %v863_v45 }
  0xe4   : > { %v1016_v7 = vor.u32 %v1015_v58, %v1011_v63  ;;  %v3275_v58 = vcombine.low %v696_v49, %v712_v54  ;;  %v3876_v63 = vld [vmem:[#allocation5 + $0x10] ss:$0 sps:$4 sm:$0xff]   ;;  %v739_v49 = vld [vmem:[#allocation2 + $0x44] sm:$0x1] }
  0xe5   : > { %922 = vrot.lane.b32.xlu1 %v3258_v0, %s4008_s24  ;;  %v3298_v0 = vcombine.low %v719_v19, %v735_v55  ;;  %v698_v55 = vld [vmem:[#allocation4 + $0x30] sm:$0xf] }
  0xe6   : > { %1092 = vrot.lane.b32.xlu0 %v3279_v3, %s4009_s25  ;;  %v1022_v3 = vrot.slane %v1020_v53, 1  ;;  %v697_v53 = vld [vmem:[#allocation4 + $0x28] sm:$0xf]  ;;  %v3261_v59 = vcombine.low %v698_v55, %v698_v55 }
  0xe7   : > { %v1196_v19 = vshll.u32 %v3298_v0, 16 }
  0xe9   : > { %1094 = vrot.lane.b32.xlu1 %v3280_v12, %s4009_s25  ;;  %v689_v12 = vld [vmem:[#allocation2 + $0x2c] sm:$0x1]  ;;  %v1198_v31 = vrot.slane %v1196_v19, 1 }
  0xea   : > { %1096 = vrot.lane.b32.xlu0 %v3281_v17, %s4009_s25  ;;  %v1023_v17 = vor.u32 %v1022_v3, %v1018_v13  ;;  %v3252_v21 = vcombine.low %v4314_v16, %v689_v12  ;;  %v3277_v3 = vcombine.low %v698_v55, %v714_v62 }
  0xec   : > { %v858_v32 = vshll.u32 %v3252_v21, 16  ;;  %v856_v44 = vshrl.u32 %v3252_v21, 16  ;;  %v1041_v14 = vshll.u32 %v3277_v3, 16 }
  0xed   : > { %1098 = vrot.lane.b32.xlu1 %v3282_v24, %s4009_s25  ;;  %v851_v24 = vshll.u32 %v3251_v10, 16  ;;  %v3278_v10 = vcombine.low %v699_v61, %v715_v4 }
  0xee   : > { %876 = vrot.lane.b32.xlu0 %v826_v29, %s4010_s26  ;;  %v4322_v29 = vld [vmem:[#allocation2 + $0x38] sm:$0xf]  ;;  %v860_v40 = vrot.slane %v858_v32, 1  ;;  %v3283_v32 = vcombine.low %v720_v28, %v720_v28 }
  0xef   : > { %v3254_v33 = vcombine.low %v4322_v29, %v691_v26  ;;  %v853_v35 = vrot.slane %v851_v24, 1  ;;  %v1048_v19 = vshll.u32 %v3278_v10, 16  ;;  %v1039_v24 = vshrl.u32 %v3277_v3, 16 }
  0xf0   : > { %v861_v46 = vor.u32 %v860_v40, %v856_v44  ;;  %v737_v40 = vld [vmem:[#allocation2 + $0x34] sm:$0x1] }
  0xf1   : > { %878 = vrot.lane.b32.xlu1 %v833_v37, %s4010_s26  ;;  %v1194_v37 = vshrl.u32 %v3298_v0, 16  ;;  %v872_v41 = vshll.u32 %v3254_v33, 16  ;;  %v870_v50 = vshrl.u32 %v3254_v33, 16  ;;  %v3276_v0 = vcombine.low %v697_v53, %v713_v60  ;;  %v721_v33 = vld [vmem:[#allocation2 + $0x30] sm:$0xf] }
  0xf2   : > { %880 = vrot.lane.b32.xlu0 %v840_v42, %s4010_s26  ;;  %v854_v42 = vor.u32 %v853_v35, %v849_v38  ;;  %v1050_v26 = vrot.slane %v1048_v19, 1  ;;  %v722_v35 = vld [vmem:[#allocation2 + $0x38] sm:$0xf]  ;;  %v3300_v43 = vcombine.low %v721_v33, %v737_v40 }
  0xf3   : > { %v1199_v39 = vor.u32 %v1198_v31, %v1194_v37  ;;  %v874_v47 = vrot.slane %v872_v41, 1  ;;  %v1034_v12 = vshll.u32 %v3276_v0, 16  ;;  %v1032_v23 = vshrl.u32 %v3276_v0, 16  ;;  %v723_v41 = vld [vmem:[#allocation2 + $0x40] sm:$0xf] }
  0xf4   : > { %v3284_v37 = vcombine.low %v721_v33, %v721_v33  ;;  %v3286_v44 = vcombine.low %v723_v41, %v723_v41  ;;  %v1208_v3 = vshrl.u32 %v3300_v43, 16 }
  0xf5   : > { %882 = vrot.lane.b32.xlu1 %v847_v5, %s4010_s26  ;;  %v875_v5 = vor.u32 %v874_v47, %v870_v50  ;;  %v1036_v18 = vrot.slane %v1034_v12, 1  ;;  %v4349_v47 = vpop.permute.xlu0 %960  ;;  %v4351_v50 = vpop.permute.xlu1 %958 }
  0xf6   : > { %1052 = vrot.lane.b32.xlu0 %v1002_v56, %s4011_s6  ;;  %v3260_v56 = vcombine.low %v697_v53, %v697_v53  ;;  %v3892_v53 = vld [vmem:[#allocation3 + $0x18] ss:$0 sps:$4 sm:$0xff]  }
  0xf7   : > { %v1037_v25 = vor.u32 %v1036_v18, %v1032_v23 }
  0xf9   : > { %1054 = vrot.lane.b32.xlu1 %v1009_v2, %s4011_s6  ;;  %v3262_v2 = vcombine.low %v699_v61, %v699_v61  ;;  %v4357_v62 = vpop.permute.xlu1 %962 }
  0xfa   : > { %1056 = vrot.lane.b32.xlu0 %v1016_v7, %s4011_s6  ;;  %v1027_v7 = vshll.u32 %v3275_v58, 16 }
  0xfc   : > { %v1029_v13 = vrot.slane %v1027_v7, 1 }
  0xfd   : > { %1058 = vrot.lane.b32.xlu1 %v1023_v17, %s4011_s6  ;;  %v1025_v17 = vshrl.u32 %v3275_v58, 16  ;;  %v3893_v58 = vld [vmem:[#allocation3 + $0x20] ss:$0 sps:$4 sm:$0xff]  }
  0xfe   : > { %1228 = vrot.lane.b32.xlu0 %v1178_v22, %s4012_s7  ;;  %v1043_v22 = vrot.slane %v1041_v14, 1 }
  0xff   : > { %v1030_v21 = vor.u32 %v1029_v13, %v1025_v17 }
 0x100   : > { %v1044_v27 = vor.u32 %v1043_v22, %v1039_v24 }
 0x101   : > { %1230 = vrot.lane.b32.xlu1 %v1185_v30, %s4012_s7  ;;  %v1046_v30 = vshrl.u32 %v3278_v10, 16 }
 0x102   : > { %1232 = vrot.lane.b32.xlu0 %v1192_v34, %s4012_s7  ;;  %v736_v34 = vld [vmem:[#allocation2 + $0x2c] sm:$0x1] }
 0x103   : > { %v1051_v31 = vor.u32 %v1050_v26, %v1046_v30  ;;  %v3299_v38 = vcombine.low %v720_v28, %v736_v34 }
 0x105   : > { %1234 = vrot.lane.b32.xlu1 %v1199_v39, %s4012_s7  ;;  %v3285_v39 = vcombine.low %v722_v35, %v722_v35  ;;  %v1203_v45 = vshll.u32 %v3299_v38, 16 }
 0x106   : > { %884 = vrot.lane.b32.xlu0 %v854_v42, %s4010_s26  ;;  %v738_v42 = vld [vmem:[#allocation2 + $0x3c] sm:$0x1] }
 0x107   : > { %v1205_v54 = vrot.slane %v1203_v45, 1 }
 0x109   : > { %886 = vrot.lane.b32.xlu1 %v861_v46, %s4010_s26  ;;  %v3301_v46 = vcombine.low %v722_v35, %v738_v42 }
 0x10a   : > { %888 = vrot.lane.b32.xlu0 %v868_v48, %s4010_s26  ;;  %v3888_v48 = vld [vmem:[#allocation3 + $0x14] ss:$0 sps:$4 sm:$0xff]  }
 0x10b   : > { %v1217_v55 = vshll.u32 %v3301_v46, 16  ;;  %v1215_v4 = vshrl.u32 %v3301_v46, 16 }
 0x10d   : > { %890 = vrot.lane.b32.xlu1 %v875_v5, %s4010_s26  ;;  %v1210_v5 = vshll.u32 %v3300_v43, 16  ;;  %v1219_v0 = vrot.slane %v1217_v55, 1 }
 0x10e   : > { %924 = vrot.lane.b32.xlu0 %v3259_v51, %s4008_s24  ;;  %v3302_v51 = vcombine.low %v723_v41, %v739_v49 }
 0x10f   : > { %v1212_v61 = vrot.slane %v1210_v5, 1  ;;  %v1220_v10 = vor.u32 %v1219_v0, %v1215_v4 }
 0x110   : > { %v1222_v12 = vshrl.u32 %v3302_v51, 16 }
 0x111   : > { %926 = vrot.lane.b32.xlu1 %v3260_v56, %s4008_s24  ;;  %v3891_v56 = vld [vmem:[#allocation3 + $0x1c] ss:$0 sps:$4 sm:$0xff]  }
 0x112   : > { %928 = vrot.lane.b32.xlu0 %v3261_v59, %s4008_s24  ;;  %v1201_v59 = vshrl.u32 %v3299_v38, 16 }
 0x115   : > { %930 = vrot.lane.b32.xlu1 %v3262_v2, %s4008_s24  ;;  %v1206_v2 = vor.u32 %v1205_v54, %v1201_v59 }
 0x116   : > { %964 = vrot.lane.b32.xlu0 %v3876_v63, %s4005_s21  ;;  %v1224_v63 = vshll.u32 %v3302_v51, 16 }
 0x118   : > { %v1226_v7 = vrot.slane %v1224_v63, 1 }
 0x119   : > { %966 = vrot.lane.b32.xlu1 %v3880_v8, %s4005_s21  ;;  %v1213_v8 = vor.u32 %v1212_v61, %v1208_v3 }
 0x11a   : > { %968 = vrot.lane.b32.xlu0 %v3879_v9, %s4005_s21  ;;  %v1227_v14 = vor.u32 %v1226_v7, %v1222_v12 }
 0x11d   : > { %970 = vrot.lane.b32.xlu1 %v3881_v15, %s4005_s21 }
 0x11e   : > { %1060 = vrot.lane.b32.xlu0 %v1030_v21, %s4011_s6 }
 0x121   : > { %1062 = vrot.lane.b32.xlu1 %v1037_v25, %s4011_s6 }
 0x122   : > { %1064 = vrot.lane.b32.xlu0 %v1044_v27, %s4011_s6 }
 0x125   : > { %1066 = vrot.lane.b32.xlu1 %v1051_v31, %s4011_s6 }
 0x126   : > { %1100 = vrot.lane.b32.xlu0 %v3283_v32, %s4009_s25 }
 0x129   : > { %1102 = vrot.lane.b32.xlu1 %v3284_v37, %s4009_s25 }
 0x12a   : > { %1104 = vrot.lane.b32.xlu0 %v3285_v39, %s4009_s25 }
 0x12d   : > { %1106 = vrot.lane.b32.xlu1 %v3286_v44, %s4009_s25 }
 0x12e   : > { %1140 = vrot.lane.b32.xlu0 %v3888_v48, %s4007_s23  ;;  %v767_v13 = vpop.permute.xlu1 %766 }
 0x12f   : > { %v765_v60 = vpop.permute.xlu0 %764  ;;  %v1250_v39 = vsel %vm1244_vm7, %v4281_v52, %v767_v13 }
 0x130   : > { %v1247_v40 = vsel %vm1244_vm7, %v4276_v57, %v765_v60 }
 0x131   : > { %1142 = vrot.lane.b32.xlu1 %v3892_v53, %s4007_s23 }
 0x132   : > { %1144 = vrot.lane.b32.xlu0 %v3891_v56, %s4007_s23 }
 0x133   : > { %v769_v9 = vpop.permute.xlu0 %768 }
 0x134   : > { %v1253_v45 = vsel %vm1244_vm7, %v4283_v1, %v769_v9 }
 0x135   : > { %1146 = vrot.lane.b32.xlu1 %v3893_v58, %s4007_s23 }
 0x136   : > { %1236 = vrot.lane.b32.xlu0 %v1206_v2, %s4012_s7 }
 0x137   : > { %v771_v15 = vpop.permute.xlu1 %770  ;;  %v1133_v17 = vpop.permute.xlu0 %1132 }
 0x138   : > { %v1256_v46 = vsel %vm1244_vm7, %v4289_v11, %v771_v15 }
 0x139   : > { %1238 = vrot.lane.b32.xlu1 %v1213_v8, %s4012_s7 }
 0x13a   : > { %1240 = vrot.lane.b32.xlu0 %v1220_v10, %s4012_s7 }
 0x13b   : > { %v1135_v18 = vpop.permute.xlu1 %1134  ;;  %v4364_v19 = vpop.permute.xlu0 %1136 }
 0x13d   : > { %1242 = vrot.lane.b32.xlu1 %v1227_v14, %s4012_s7 }
 0x147   : > { %v4366_v21 = vpop.permute.xlu1 %1138 }
 0x148   : > { %v4368_v22 = vpop.permute.xlu0 %772 }
 0x14b   : > { %v4370_v23 = vpop.permute.xlu1 %774 }
 0x14c   : > { %v4372_v24 = vpop.permute.xlu0 %776 }
 0x14f   : > { %v4374_v25 = vpop.permute.xlu1 %778 }
 0x150   : > { %v917_v26 = vpop.permute.xlu0 %916 }
 0x153   : > { %v919_v27 = vpop.permute.xlu1 %918 }
 0x154   : > { %v921_v28 = vpop.permute.xlu0 %920 }
 0x157   : > { %v923_v30 = vpop.permute.xlu1 %922 }
 0x158   : > { %v1093_v31 = vpop.permute.xlu0 %1092 }
 0x15b   : > { %v1095_v32 = vpop.permute.xlu1 %1094 }
 0x15c   : > { %v1097_v33 = vpop.permute.xlu0 %1096 }
 0x15f   : > { %v1099_v34 = vpop.permute.xlu1 %1098 }
 0x160   : > { %v877_v35 = vpop.permute.xlu0 %876 }
 0x161   : > { %v1271_v41 = vsel %vm1269_vm8, %v1247_v40, %v877_v35 }
 0x162   : > { %v1288_v48 = vsel %vm1286_vm9, %v1271_v41, %v917_v26 }
 0x163   : > { %v879_v37 = vpop.permute.xlu1 %878  ;;  %v1305_v51 = vsel %vm1303_vm10, %v1288_v48, %v4345_v36 }
 0x164   : > { %v881_v38 = vpop.permute.xlu0 %880  ;;  %v1273_v42 = vsel %vm1269_vm8, %v1250_v39, %v879_v37 }
 0x165   : > { %v1290_v52 = vsel %vm1286_vm9, %v1273_v42, %v919_v27  ;;  %v1275_v57 = vsel %vm1269_vm8, %v1253_v45, %v881_v38 }
 0x166   : > { %v1307_v1 = vsel %vm1303_vm10, %v1290_v52, %v4351_v50  ;;  %v1292_v11 = vsel %vm1286_vm9, %v1275_v57, %v921_v28  ;;  %v1259_v57 = vsel %vm1244_vm7, %v4309_v6, %v4368_v22  ;;  %v1265_v6 = vsel %vm1244_vm7, %v4316_v20, %v4372_v24 }
 0x167   : > { %v883_v43 = vpop.permute.xlu1 %882  ;;  %v1309_v36 = vsel %vm1303_vm10, %v1292_v11, %v4349_v47 }
 0x168   : > { %v1053_v44 = vpop.permute.xlu0 %1052  ;;  %v1277_v49 = vsel %vm1269_vm8, %v1256_v46, %v883_v43 }
 0x169   : > { %v1294_v54 = vsel %vm1286_vm9, %v1277_v49, %v923_v30  ;;  %v1322_v55 = vsel %vm1320_vm11, %v1305_v51, %v1053_v44  ;;  %v1262_v49 = vsel %vm1244_vm7, %v4314_v16, %v4370_v23  ;;  %v1268_v16 = vsel %vm1244_vm7, %v4322_v29, %v4374_v25 }
 0x16a   : > { %v1339_v59 = vsel %vm1337_vm12, %v1322_v55, %v1093_v31  ;;  %v1311_v50 = vsel %vm1303_vm10, %v1294_v54, %v4357_v62  ;;  %vm1824_vm7 = vsmask.f32 7950 }
 0x16b   : > { %v1055_v5 = vpop.permute.xlu1 %1054  ;;  %v1356_v2 = vsel %vm1354_vm13, %v1339_v59, %v1133_v17 }
 0x16c   : > { %v1057_v53 = vpop.permute.xlu0 %1056  ;;  %v1324_v56 = vsel %vm1320_vm11, %v1307_v1, %v1055_v5 }
 0x16d   : > { %v1341_v60 = vsel %vm1337_vm12, %v1324_v56, %v1095_v32  ;;  %v1326_v63 = vsel %vm1320_vm11, %v1309_v36, %v1057_v53 }
 0x16e   : > { %v1358_v3 = vsel %vm1354_vm13, %v1341_v60, %v1135_v18  ;;  %v1343_v7 = vsel %vm1337_vm12, %v1326_v63, %v1097_v33 }
 0x16f   : > { %v1059_v58 = vpop.permute.xlu1 %1058  ;;  %v1360_v12 = vsel %vm1354_vm13, %v1343_v7, %v4364_v19 }
 0x170   : > { %v1229_v61 = vpop.permute.xlu0 %1228  ;;  %v1328_v0 = vsel %vm1320_vm11, %v1311_v50, %v1059_v58 }
 0x171   : > { %v1345_v8 = vsel %vm1337_vm12, %v1328_v0, %v1099_v34  ;;  %v1373_v47 = vsel %vm1371_vm14, %v1356_v2, %v1229_v61 }
 0x172   : > { %v1362_v13 = vsel %vm1354_vm13, %v1345_v8, %v4366_v21 }
 0x173   : > { %v1231_v4 = vpop.permute.xlu1 %1230 }
 0x174   : > { %v1375_v62 = vsel %vm1371_vm14, %v1358_v3, %v1231_v4  ;;  %v1233_v9 = vpop.permute.xlu0 %1232 }
 0x175   : > { %v3303_v10 = vcombine.low %v1373_v47, %v1375_v62  ;;  %v1377_v15 = vsel %vm1371_vm14, %v1360_v12, %v1233_v9 }
 0x177   : > { %v1235_v14 = vpop.permute.xlu1 %1234  ;;  %3730 = vmatprep.mubr.msk.bf16.mxu0 %vm1428_vm15, %v3303_v10 }
 0x178   : > { %v1379_v17 = vsel %vm1371_vm14, %v1362_v13, %v1235_v14  ;;  %v885_v18 = vpop.permute.xlu0 %884 }
 0x179   : > { %v3304_v26 = vcombine.low %v1377_v15, %v1379_v17  ;;  %v1279_v5 = vsel %vm1269_vm8, %v1259_v57, %v885_v18  ;;  %v3897_v17 = vld [vmem:[%s5000_s2 + $0x138] sm:$0xff]  }
 0x17a   : > { %v3899_v18 = vld [vmem:[%s5000_s2 + $0x178] sm:$0xff]   ;;  %3568 = vmatprep.subr.bf16.mxu1 %v3897_v17 }
 0x17b   : > { %v887_v27 = vpop.permute.xlu1 %886  ;;  %3731 = vmatmul.mubr.msk.bf16.vlgmr.msra.gmra.mxu0 %vm1428_vm15, %v3304_v26  ;;  %v3898_v26 = vld [vmem:[%s5000_s2 + $0xf8] sm:$0xff]   ;;  %3738 = vmatprep.subr.bf16.mxu0 %v3899_v18 }
 0x17c   : > { %v889_v28 = vpop.permute.xlu0 %888  ;;  %v1281_v51 = vsel %vm1269_vm8, %v1262_v49, %v887_v27  ;;  %3569 = vmatpush3.bf16.msra.mxu1 %v3898_v26  ;;  %3739 = vmatpush3.bf16.msra.mxu0 %v3899_v18  ;;  %v3900_v27 = vld [vmem:[%s5000_s2 + $0x130] sm:$0xff]   ;;  %v4540_v57 = vld [vmem:[%s5000_s2 + $0xb8] sm:$0xff]  }
 0x17d   : > { %v1283_v58 = vsel %vm1269_vm8, %v1265_v6, %v889_v28  ;;  %v3902_v28 = vld [vmem:[%s5000_s2 + $0x170] sm:$0xff]   ;;  %3570 = vmatprep.subr.bf16.mxu1 %v3900_v27 }
 0x17e   : > { %3740 = vmatprep.subr.bf16.mxu0 %v3902_v28 }
 0x17f   : > { %v891_v30 = vpop.permute.xlu1 %890 }
 0x180   : > { %v925_v31 = vpop.permute.xlu0 %924  ;;  %v1285_v59 = vsel %vm1269_vm8, %v1268_v16, %v891_v30  ;;  %v3901_v30 = vld [vmem:[%s5000_s2 + $0xf0] sm:$0xff]   ;;  %3741 = vmatpush3.bf16.msra.mxu0 %v3902_v28  ;;  %vm4615_vm8 = vmand %vm1731_vm2, %vm300_vm4 }
 0x181   : > { %v1296_v1 = vsel %vm1286_vm9, %v1279_v5, %v925_v31  ;;  %3571 = vmatpush3.bf16.msra.mxu1 %v3901_v30  ;;  %v3903_v31 = vld [vmem:[%s5000_s2 + $0x128] sm:$0xff]   ;;  %vm4626_vm4 = vmand %vm1823_vm6, %vm1824_vm7 }
 0x182   : > { %3572 = vmatprep.subr.bf16.mxu1 %v3903_v31 }
 0x183   : > { %v927_v32 = vpop.permute.xlu1 %926 }
 0x184   : > { %v929_v19 = vpop.permute.xlu0 %928  ;;  %v1298_v53 = vsel %vm1286_vm9, %v1281_v51, %v927_v32  ;;  %v3905_v32 = vld [vmem:[%s5000_s2 + $0x168] sm:$0xff]  }
 0x185   : > { %v1300_v50 = vsel %vm1286_vm9, %v1283_v58, %v929_v19  ;;  %v3904_v19 = vld [vmem:[%s5000_s2 + $0xe8] sm:$0xff]   ;;  %3742 = vmatprep.subr.bf16.mxu0 %v3905_v32 }
 0x186   : > { %3573 = vmatpush3.bf16.msra.mxu1 %v3904_v19  ;;  %3743 = vmatpush3.bf16.msra.mxu0 %v3905_v32 }
 0x187   : > { %v931_v33 = vpop.permute.xlu1 %930 }
 0x188   : > { %v965_v34 = vpop.permute.xlu0 %964  ;;  %v1302_v20 = vsel %vm1286_vm9, %v1285_v59, %v931_v33  ;;  %v3906_v33 = vld [vmem:[%s5000_s2 + $0x120] sm:$0xff]  }
 0x189   : > { %v1313_v54 = vsel %vm1303_vm10, %v1296_v1, %v965_v34  ;;  %v3908_v34 = vld [vmem:[%s5000_s2 + $0x160] sm:$0xff]   ;;  %3574 = vmatprep.subr.bf16.mxu1 %v3906_v33 }
 0x18a   : > { %3744 = vmatprep.subr.bf16.mxu0 %v3908_v34 }
 0x18b   : > { %v967_v21 = vpop.permute.xlu1 %966  ;;  %3745 = vmatpush3.bf16.msra.mxu0 %v3908_v34 }
 0x18c   : > { %v969_v35 = vpop.permute.xlu0 %968  ;;  %v1315_v55 = vsel %vm1303_vm10, %v1298_v53, %v967_v21  ;;  %v3907_v21 = vld [vmem:[%s5000_s2 + $0xe0] sm:$0xff]  }
 0x18d   : > { %v1317_v61 = vsel %vm1303_vm10, %v1300_v50, %v969_v35  ;;  %3575 = vmatpush3.bf16.msra.mxu1 %v3907_v21  ;;  %v3909_v35 = vld [vmem:[%s5000_s2 + $0x118] sm:$0xff]  }
 0x18e   : > { %3576 = vmatprep.subr.bf16.mxu1 %v3909_v35 }
 0x18f   : > { %v971_v37 = vpop.permute.xlu1 %970 }
 0x190   : > { %v1061_v38 = vpop.permute.xlu0 %1060  ;;  %v1319_v63 = vsel %vm1303_vm10, %v1302_v20, %v971_v37  ;;  %v3911_v37 = vld [vmem:[%s5000_s2 + $0x158] sm:$0xff]  }
 0x191   : > { %v1330_v22 = vsel %vm1320_vm11, %v1313_v54, %v1061_v38  ;;  %v3910_v38 = vld [vmem:[%s5000_s2 + $0xd8] sm:$0xff]   ;;  %3746 = vmatprep.subr.bf16.mxu0 %v3911_v37 }
 0x192   : > { %3577 = vmatpush3.bf16.msra.mxu1 %v3910_v38  ;;  %3747 = vmatpush3.bf16.msra.mxu0 %v3911_v37 }
 0x193   : > { %v1063_v39 = vpop.permute.xlu1 %1062 }
 0x194   : > { %v1065_v40 = vpop.permute.xlu0 %1064  ;;  %v1332_v23 = vsel %vm1320_vm11, %v1315_v55, %v1063_v39  ;;  %v3912_v39 = vld [vmem:[%s5000_s2 + $0x110] sm:$0xff]  }
 0x195   : > { %v1334_v3 = vsel %vm1320_vm11, %v1317_v61, %v1065_v40  ;;  %v3914_v40 = vld [vmem:[%s5000_s2 + $0x150] sm:$0xff]   ;;  %3578 = vmatprep.subr.bf16.mxu1 %v3912_v39 }
 0x196   : > { %3748 = vmatprep.subr.bf16.mxu0 %v3914_v40 }
 0x197   : > { %v1067_v41 = vpop.permute.xlu1 %1066  ;;  %3749 = vmatpush3.bf16.msra.mxu0 %v3914_v40 }
 0x198   : > { %v1101_v42 = vpop.permute.xlu0 %1100  ;;  %v1336_v4 = vsel %vm1320_vm11, %v1319_v63, %v1067_v41  ;;  %v3913_v41 = vld [vmem:[%s5000_s2 + $0xd0] sm:$0xff]  }
 0x199   : > { %v1347_v60 = vsel %vm1337_vm12, %v1330_v22, %v1101_v42  ;;  %v3915_v42 = vld [vmem:[%s5000_s2 + $0x108] sm:$0xff]   ;;  %3579 = vmatpush3.bf16.msra.mxu1 %v3913_v41 }
 0x19a   : > { %3580 = vmatprep.subr.bf16.mxu1 %v3915_v42 }
 0x19b   : > { %v1103_v43 = vpop.permute.xlu1 %1102 }
 0x19c   : > { %v1105_v44 = vpop.permute.xlu0 %1104  ;;  %v1349_v36 = vsel %vm1337_vm12, %v1332_v23, %v1103_v43  ;;  %v3917_v43 = vld [vmem:[%s5000_s2 + $0x148] sm:$0xff]  }
 0x19d   : > { %v1351_v47 = vsel %vm1337_vm12, %v1334_v3, %v1105_v44  ;;  %v3916_v44 = vld [vmem:[%s5000_s2 + $0xc8] sm:$0xff]   ;;  %3750 = vmatprep.subr.bf16.mxu0 %v3917_v43 }
 0x19e   : > { %3581 = vmatpush3.bf16.msra.mxu1 %v3916_v44  ;;  %3751 = vmatpush3.bf16.msra.mxu0 %v3917_v43 }
 0x19f   : > { %v1107_v45 = vpop.permute.xlu1 %1106 }
 0x1a0   : > { %v1141_v46 = vpop.permute.xlu0 %1140  ;;  %v1353_v62 = vsel %vm1337_vm12, %v1336_v4, %v1107_v45  ;;  %v3918_v45 = vld [vmem:[%s5000_s2 + $0x100] sm:$0xff]  }
 0x1a1   : > { %v1364_v24 = vsel %vm1354_vm13, %v1347_v60, %v1141_v46  ;;  %v3920_v46 = vld [vmem:[%s5000_s2 + $0x140] sm:$0xff]   ;;  %3582 = vmatprep.subr.bf16.mxu1 %v3918_v45 }
 0x1a2   : > { %3752 = vmatprep.subr.bf16.mxu0 %v3920_v46 }
 0x1a3   : > { %v1143_v48 = vpop.permute.xlu1 %1142  ;;  %3753 = vmatpush3.bf16.msra.mxu0 %v3920_v46 }
 0x1a4   : > { %v1145_v52 = vpop.permute.xlu0 %1144  ;;  %v1366_v29 = vsel %vm1354_vm13, %v1349_v36, %v1143_v48  ;;  %v3919_v48 = vld [vmem:[%s5000_s2 + $0xc0] sm:$0xff]   ;;  %3762 = vmatprep.subr.bf16.mxu0 %v4540_v57 }
 0x1a5   : > { %v1368_v9 = vsel %vm1354_vm13, %v1351_v47, %v1145_v52  ;;  %v3923_v52 = vld [vmem:[%s5000_s2 + $0x78] sm:$0xff]   ;;  %3583 = vmatpush3.bf16.msra.mxu1 %v3919_v48 }
 0x1a6   : > { %3620 = vmatprep.subr.bf16.mxu1 %v3923_v52 }
 0x1a7   : > { %v1147_v11 = vpop.permute.xlu1 %1146 }
 0x1a8   : > { %v1237_v56 = vpop.permute.xlu0 %1236  ;;  %v1370_v10 = vsel %vm1354_vm13, %v1353_v62, %v1147_v11 }
 0x1a9   : > { %v1381_v0 = vsel %vm1371_vm14, %v1364_v24, %v1237_v56 }
 0x1ab   : > { %v1239_v25 = vpop.permute.xlu1 %1238 }
 0x1ac   : > { %v1383_v2 = vsel %vm1371_vm14, %v1366_v29, %v1239_v25  ;;  %v1241_v8 = vpop.permute.xlu0 %1240 }
 0x1ad   : > { %v3305_v7 = vcombine.low %v1381_v0, %v1383_v2  ;;  %v1385_v13 = vsel %vm1371_vm14, %v1368_v9, %v1241_v8 }
 0x1af   : > { %v1243_v12 = vpop.permute.xlu1 %1242  ;;  %3734 = vmatprep.mubr.msk.bf16.mxu0 %vm1428_vm15, %v3305_v7 }
 0x1b0   : > { %v1387_v14 = vsel %vm1371_vm14, %v1370_v10, %v1243_v12 }
 0x1b1   : > { %v3306_v15 = vcombine.low %v1385_v13, %v1387_v14 }
 0x1b3   : > { %3735 = vmatmul.mubr.msk.bf16.gmra.mxu0 %vm1428_vm15, %v3306_v15 }
 0x23b   : > { %v3732_v49 = vpop.f32.mrf.mxu0 }
 0x23c   : > { %v1527_v56 = vmul.f32 %v3732_v49, %v3732_v49 }
 0x23d   : > { %v1479_v5 = vpop.f32.mrf.mxu0 }
 0x23e   : > { %v1525_v11 = vmul.f32 %v1479_v5, %v1479_v5 }
 0x23f   : > { %v3733_v51 = vpop.f32.mrf.mxu0 }
 0x240   : > { %v1528_v58 = vmul.f32 %v3733_v51, %v3733_v51 }
 0x241   : > { %v1482_v1 = vpop.f32.mrf.mxu0 }
 0x242   : > { %v1526_v53 = vmul.f32 %v1482_v1, %v1482_v1  ;;  %v1510_v54 = vadd.f32 %v1482_v1, %v1479_v5 }
 0x244   : > { %v1533_v55 = vadd.f32 %v1526_v53, %v1525_v11  ;;  %v1511_v6 = vadd.f32 %v3732_v49, %v1510_v54 }
 0x246   : > { %v1534_v22 = vadd.f32 %v1533_v55, %v1527_v56  ;;  %v1512_v59 = vadd.f32 %v3733_v51, %v1511_v6 }
 0x248   : > { %v1535_v20 = vadd.f32 %v1534_v22, %v1528_v58 }
 0x273   : > { %v3736_v16 = vpop.f32.mrf.mxu0 }
 0x274   : > { %v1531_v63 = vmul.f32 %v3736_v16, %v3736_v16 }
 0x275   : > { %v1495_v23 = vpop.f32.mrf.mxu0 }
 0x276   : > { %v1529_v60 = vmul.f32 %v1495_v23, %v1495_v23  ;;  %v1513_v50 = vadd.f32 %v1512_v59, %v1495_v23 }
 0x277   : > { %v3737_v36 = vpop.f32.mrf.mxu0 }
 0x278   : > { %v1536_v29 = vadd.f32 %v1535_v20, %v1529_v60  ;;  %v1532_v3 = vmul.f32 %v3737_v36, %v3737_v36 }
 0x279   : > { %v1498_v24 = vpop.f32.mrf.mxu0 }
 0x27a   : > { %v1514_v25 = vadd.f32 %v1513_v50, %v1498_v24  ;;  %v1530_v61 = vmul.f32 %v1498_v24, %v1498_v24 }
 0x27c   : > { %v1515_v0 = vadd.f32 %v3736_v16, %v1514_v25  ;;  %v1537_v2 = vadd.f32 %v1536_v29, %v1530_v61 }
 0x27e   : > { %v1516_v4 = vadd.f32 %v3737_v36, %v1515_v0  ;;  %v1538_v7 = vadd.f32 %v1537_v2, %v1531_v63  ;;  %v1698_v2 = vld [vmem:[#allocation6 + $0x48] sm:$0xf] }
 0x280   : > { %v1517_v8 = vrot.slane %v1516_v4, 4  ;;  %v1539_v47 = vadd.f32 %v1538_v7, %v1532_v3 }
 0x282   : > { %v1518_v62 = vadd.f32 %v1517_v8, %v1516_v4  ;;  %v1540_v9 = vrot.slane %v1539_v47, 4 }
 0x284   : > { %v1519_v10 = vrot.slane %v1518_v62, 2  ;;  %v1541_v12 = vadd.f32 %v1540_v9, %v1539_v47  ;;  %v1683_v9 = vld [vmem:[#allocation6 + $0xc] sm:$0xf] }
 0x286   : > { %v1520_v13 = vadd.f32 %v1519_v10, %v1518_v62  ;;  %v1542_v14 = vrot.slane %v1541_v12, 2 }
 0x288   : > { %v1521_v15 = vrot.slane %v1520_v13, 1  ;;  %v1543_v17 = vadd.f32 %v1542_v14, %v1541_v12 }
 0x28a   : > { %v1522_v18 = vadd.f32 %v1521_v15, %v1520_v13  ;;  %v1544_v26 = vrot.slane %v1543_v17, 1 }
 0x28c   : > { %v1524_v27 = vmul.f32 0.015625, %v1522_v18  ;;  %v1545_v28 = vadd.f32 %v1544_v26, %v1543_v17  ;;  %v1686_v17 = vld [vmem:[#allocation6 + $0x18] sm:$0xf]  ;;  %v1689_v26 = vld [vmem:[#allocation6 + $0x24] sm:$0xf] }
 0x28e   : > { %v1546_v30 = vmul.f32 0.015625, %v1545_v28  ;;  %v1547_v31 = vmul.f32 %v1524_v27, %v1524_v27  ;;  %v1555_v34 = vsub.f32 %v1498_v24, %v1524_v27  ;;  %v1550_v21 = vsub.f32 %v1479_v5, %v1524_v27 }
 0x28f   : > { %v1551_v35 = vsub.f32 %v1482_v1, %v1524_v27  ;;  %v1552_v37 = vsub.f32 %v3732_v49, %v1524_v27  ;;  %v1553_v39 = vsub.f32 %v3733_v51, %v1524_v27  ;;  %v1554_v40 = vsub.f32 %v1495_v23, %v1524_v27 }
 0x290   : > { %v1548_v32 = vsub.f32 %v1546_v30, %v1547_v31  ;;  %v1556_v41 = vsub.f32 %v3736_v16, %v1524_v27  ;;  %v1557_v42 = vsub.f32 %v3737_v36, %v1524_v27  ;;  %v1806_v30 = vld [vmem:[#allocation6 + $0x50] sm:$0xf] }
 0x292   : > { %v1549_v19 = vmax.f32 %v1548_v32, 0.0 }
 0x294   : > { %v1558_v33 = vadd.f32 1e-05, %v1549_v19 }
 0x296   : > { %3990 = vrsqrt.f32 %v1558_v33 }
 0x2a3   : > { %v3991_v38 = vpop.eup %3990 }
 0x2a4   : > { %v1565_v43 = vmul.f32 %v3991_v38, %v1555_v34  ;;  %v1560_v44 = vmul.f32 %v3991_v38, %v1550_v21  ;;  %v1561_v45 = vmul.f32 %v3991_v38, %v1551_v35  ;;  %v1562_v46 = vmul.f32 %v3991_v38, %v1552_v37 }
 0x2a5   : > { %v1563_v48 = vmul.f32 %v3991_v38, %v1553_v39  ;;  %v1564_v52 = vmul.f32 %v3991_v38, %v1554_v40  ;;  %v1566_v53 = vmul.f32 %v3991_v38, %v1556_v41  ;;  %v1567_v11 = vmul.f32 %v3991_v38, %v1557_v42 }
 0x2a6   : > { %v1573_v54 = vmax.f32 %v1565_v43, 0.0  ;;  %v1568_v55 = vmax.f32 %v1560_v44, 0.0  ;;  %v1569_v56 = vmax.f32 %v1561_v45, 0.0  ;;  %v1570_v6 = vmax.f32 %v1562_v46, 0.0  ;;  %v1692_v46 = vld [vmem:[#allocation6 + $0x30] sm:$0xf] }
 0x2a7   : > { %v1571_v5 = vmax.f32 %v1563_v48, 0.0  ;;  %v1572_v1 = vmax.f32 %v1564_v52, 0.0  ;;  %v1574_v49 = vmax.f32 %v1566_v53, 0.0  ;;  %v1575_v22 = vmax.f32 %v1567_v11, 0.0 }
 0x2a8   : > { %v1581_v51 = vpack.c.bf16 %v1573_v54, %v1573_v54  ;;  %v1576_v23 = vpack.c.bf16 %v1568_v55, %v1568_v55  ;;  %v1577_v16 = vpack.c.bf16 %v1569_v56, %v1569_v56  ;;  %v1578_v58 = vpack.c.bf16 %v1570_v6, %v1570_v6  ;;  %v1791_v56 = vld [vmem:[#allocation6 + $0x14] sm:$0xf] }
 0x2a9   : > { %v1579_v59 = vpack.c.bf16 %v1571_v5, %v1571_v5  ;;  %v4543_v60 = vpack.c.bf16 %v1572_v1, %v1572_v1  ;;  %v4545_v36 = vpack.c.bf16 %v1574_v49, %v1574_v49  ;;  %v4547_v50 = vpack.c.bf16 %v1575_v22, %v1575_v22  ;;  %v1794_v22 = vld [vmem:[#allocation6 + $0x20] sm:$0xf] }
 0x2aa   : > { %1590 = vst [vmem:[#allocation6 + $0x4c] sm:$0xf] %v1581_v51  ;;  %v1653_v20 = vshrl.u32 %v1581_v51, 16  ;;  %v4549_v24 = vshll.u32 %v1581_v51, 16  ;;  %1585 = vst [vmem:[#allocation6 + $0x10] sm:$0xf] %v1576_v23 }
 0x2ab   : > { %1586 = vst [vmem:[#allocation6 + $0x1c] sm:$0xf] %v1577_v16  ;;  %v1618_v29 = vshrl.u32 %v1576_v23, 16  ;;  %1587 = vst [vmem:[#allocation6 + $0x28] sm:$0xf] %v1578_v58  ;;  %v4551_v25 = vshll.u32 %v1576_v23, 16 }
 0x2ac   : > { %v1625_v61 = vshrl.u32 %v1577_v16, 16  ;;  %1588 = vst [vmem:[#allocation6 + $0x34] sm:$0xf] %v1579_v59  ;;  %v1632_v63 = vshrl.u32 %v1578_v58, 16  ;;  %1589 = vst [vmem:[#allocation6 + $0x40] sm:$0xf] %v4543_v60 }
 0x2ad   : > { %1591 = vst [vmem:[#allocation6 + $0x58] sm:$0xf] %v4545_v36  ;;  %1592 = vst [vmem:[#allocation6 + $0x64] sm:$0xf] %v4547_v50  ;;  %v1655_v0 = vrot.slane %v1653_v20, 7  ;;  %v4556_v3 = vrot.slane %v1653_v20, 4 }
 0x2ae   : > { %v1772_v4 = vrot.slane %v4549_v24, 5  ;;  %v1620_v7 = vrot.slane %v1618_v29, 7  ;;  %v1627_v47 = vrot.slane %v1625_v61, 7  ;;  %v4565_v62 = vshll.u32 %v1577_v16, 16  ;;  %v1797_v51 = vld [vmem:[#allocation6 + $0x2c] sm:$0xf] }
 0x2af   : > { %v1634_v10 = vrot.slane %v1632_v63, 7  ;;  %v4567_v12 = vshll.u32 %v1578_v58, 16  ;;  %v1658_v13 = vor.u32 %v4549_v24, %v1655_v0  ;;  %v4572_v18 = vrot.slane %v1618_v29, 4  ;;  %v1800_v20 = vld [vmem:[#allocation6 + $0x38] sm:$0xf]  ;;  %v3936_v16 = vld [vmem:[%s5000_s2 + $0xa8] sm:$0xff]  }
 0x2b0   : > { %v1773_v14 = vor.u32 %v1772_v4, %v4556_v3  ;;  %v1623_v15 = vor.u32 %v4551_v25, %v1620_v7  ;;  %v1718_v27 = vrot.slane %v4556_v3, 4  ;;  %v1630_v31 = vor.u32 %v4565_v62, %v1627_v47  ;;  %v1695_v3 = vld [vmem:[#allocation6 + $0x3c] sm:$0xf]  ;;  %v3942_v7 = vld [vmem:[%s5000_s2 + $0x58] sm:$0xff]  }
 0x2b1   : > { %v4582_v32 = vrot.slane %v1625_v61, 4  ;;  %v1637_v19 = vor.u32 %v4567_v12, %v1634_v10  ;;  %v1699_v33 = vsel %vm4561_vm5, %v1658_v13, %v1698_v2  ;;  %v1639_v35 = vshrl.u32 %v1579_v59, 16 }
 0x2b2   : > { %v1774_v34 = vrot.slane %v1773_v14, 4  ;;  %v1684_v21 = vsel %vm4561_vm5, %v1623_v15, %v1683_v9  ;;  %1700 = vst [vmem:[#allocation6 + $0x48] sm:$0xf] %v1699_v33  ;;  %v1687_v37 = vsel %vm4561_vm5, %v1630_v31, %v1686_v17  ;;  %v4591_v38 = vshll.u32 %v1579_v59, 16 }
 0x2b3   : > { %1685 = vst [vmem:[#allocation6 + $0xc] sm:$0xf] %v1684_v21  ;;  %v1690_v39 = vsel %vm4561_vm5, %v1637_v19, %v1689_v26  ;;  %v1711_v40 = vrot.slane %v1632_v63, 4  ;;  %1688 = vst [vmem:[#allocation6 + $0x18] sm:$0xf] %v1687_v37  ;;  %v1641_v42 = vrot.slane %v1639_v35, 7 }
 0x2b4   : > { %v1807_v41 = vsel %vm4577_vm1, %v1774_v34, %v1806_v30  ;;  %1691 = vst [vmem:[#allocation6 + $0x24] sm:$0xf] %v1690_v39  ;;  %v4597_v43 = vrot.slane %v1639_v35, 4  ;;  %v1763_v44 = vrot.slane %v4567_v12, 5  ;;  %v1708_v45 = vrot.slane %v4572_v18, 4 }
 0x2b5   : > { %1808 = vst [vmem:[#allocation6 + $0x50] sm:$0xf] %v1807_v41  ;;  %v1766_v48 = vrot.slane %v4591_v38, 5  ;;  %v1757_v52 = vrot.slane %v4551_v25, 5  ;;  %v1760_v53 = vrot.slane %v4565_v62, 5  ;;  %v1710_v11 = vrot.slane %v4582_v32, 4 }
 0x2b6   : > { %v1644_v54 = vor.u32 %v4591_v38, %v1641_v42  ;;  %v1764_v55 = vor.u32 %v1763_v44, %v1711_v40  ;;  %v1646_v6 = vshrl.u32 %v4543_v60, 16  ;;  %v4611_v23 = vshll.u32 %v4543_v60, 16  ;;  %v1803_v35 = vld [vmem:[#allocation6 + $0x44] sm:$0xf] }
 0x2b7   : > { %v1767_v5 = vor.u32 %v1766_v48, %v4597_v43  ;;  %v1758_v1 = vor.u32 %v1757_v52, %v4572_v18  ;;  %v1761_v49 = vor.u32 %v1760_v53, %v4582_v32  ;;  %v1712_v9 = vrot.slane %v1711_v40, 4 }
 0x2b8   : > { %v1693_v58 = vsel %vm4561_vm5, %v1644_v54, %v1692_v46  ;;  %v1765_v59 = vrot.slane %v1764_v55, 4  ;;  %v4621_v29 = vrot.slane %v1646_v6, 4  ;;  %v1648_v61 = vrot.slane %v1646_v6, 7  ;;  %v1704_v55 = vld [vmem:[#allocation6 + $0x60] sm:$0xf] }
 0x2b9   : > { %1694 = vst [vmem:[#allocation6 + $0x30] sm:$0xf] %v1693_v58  ;;  %v1768_v63 = vrot.slane %v1767_v5, 4  ;;  %v1759_v0 = vrot.slane %v1758_v1, 4  ;;  %v1762_v2 = vrot.slane %v1761_v49, 4  ;;  %v1769_v60 = vrot.slane %v4611_v23, 5 }
 0x2ba   : > { %v1748_v4 = vld [vmem:[#allocation6 + $0x48] sm:$0x1]  ;;  %v1733_v47 = vld [vmem:[#allocation6 + $0xc] sm:$0x1]  ;;  %v1798_v10 = vsel %vm4577_vm1, %v1765_v59, %v1797_v51  ;;  %v1651_v13 = vor.u32 %v4611_v23, %v1648_v61  ;;  %v1660_v14 = vshrl.u32 %v4545_v36, 16  ;;  %v4655_v39 = vshll.u32 %v4545_v36, 16 }
 0x2bb   : > { %v1749_v15 = vsel %vm4615_vm8, %v1718_v27, %v1748_v4  ;;  %v1734_v17 = vsel %vm4615_vm8, %v1708_v45, %v1733_v47  ;;  %v1736_v18 = vld [vmem:[#allocation6 + $0x18] sm:$0x1]  ;;  %v1739_v26 = vld [vmem:[#allocation6 + $0x24] sm:$0x1]  ;;  %v1792_v30 = vsel %vm4577_vm1, %v1759_v0, %v1791_v56  ;;  %v1795_v31 = vsel %vm4577_vm1, %v1762_v2, %v1794_v22  ;;  %1799 = vst [vmem:[#allocation6 + $0x2c] sm:$0xf] %v1798_v10 }
 0x2bc   : > { %1750 = vst [vmem:[#allocation6 + $0x48] sm:$0x1] %v1749_v15  ;;  %v1841_v32 = vld [vmem:[#allocation6 + $0x50] sm:$0x8]  ;;  %1735 = vst [vmem:[#allocation6 + $0xc] sm:$0x1] %v1734_v17  ;;  %v1737_v19 = vsel %vm4615_vm8, %v1710_v11, %v1736_v18  ;;  %v1740_v27 = vsel %vm4615_vm8, %v1712_v9, %v1739_v26  ;;  %v1801_v33 = vsel %vm4577_vm1, %v1768_v63, %v1800_v20 }
 0x2bd   : > { %1793 = vst [vmem:[#allocation6 + $0x14] sm:$0xf] %v1792_v30  ;;  %1796 = vst [vmem:[#allocation6 + $0x20] sm:$0xf] %v1795_v31  ;;  %v1770_v34 = vor.u32 %v1769_v60, %v4621_v29  ;;  %v1842_v21 = vsel %vm4626_vm4, %v4549_v24, %v1841_v32  ;;  %v1696_v37 = vsel %vm4561_vm5, %v1651_v13, %v1695_v3  ;;  %v1667_v40 = vshrl.u32 %v4547_v50, 16  ;;  %v3930_v13 = vld [vmem:[%s5000_s2 + $0x70] sm:$0xff]  }
 0x2be   : > { %1738 = vst [vmem:[#allocation6 + $0x18] sm:$0x1] %v1737_v19  ;;  %1741 = vst [vmem:[#allocation6 + $0x24] sm:$0x1] %v1740_v27  ;;  %v4659_v42 = vshll.u32 %v4547_v50, 16  ;;  %v4661_v44 = vrot.slane %v1660_v14, 4 }
 0x2bf   : > { %1802 = vst [vmem:[#allocation6 + $0x38] sm:$0xf] %v1801_v33  ;;  %1843 = vst [vmem:[#allocation6 + $0x50] sm:$0x8] %v1842_v21  ;;  %v1771_v41 = vrot.slane %v1770_v34, 4  ;;  %v1662_v24 = vrot.slane %v1660_v14, 7 }
 0x2c0   : > { %1697 = vst [vmem:[#allocation6 + $0x3c] sm:$0xf] %v1696_v37  ;;  %v1714_v45 = vrot.slane %v4597_v43, 4  ;;  %v4664_v46 = vrot.slane %v1667_v40, 4  ;;  %v1775_v48 = vrot.slane %v4655_v39, 5  ;;  %v1669_v52 = vrot.slane %v1667_v40, 7 }
 0x2c1   : > { %v1701_v36 = vld [vmem:[#allocation6 + $0x54] sm:$0xf]  ;;  %v1742_v53 = vld [vmem:[#allocation6 + $0x30] sm:$0x1]  ;;  %v1804_v11 = vsel %vm4577_vm1, %v1771_v41, %v1803_v35  ;;  %v1778_v54 = vrot.slane %v4659_v42, 5  ;;  %v1665_v50 = vor.u32 %v4655_v39, %v1662_v24  ;;  %v1716_v47 = vrot.slane %v4621_v29, 4 }
 0x2c2   : > { %v1743_v56 = vsel %vm4615_vm8, %v1714_v45, %v1742_v53  ;;  %1805 = vst [vmem:[#allocation6 + $0x44] sm:$0xf] %v1804_v11  ;;  %v1776_v43 = vor.u32 %v1775_v48, %v4661_v44  ;;  %v1672_v6 = vor.u32 %v4659_v42, %v1669_v52  ;;  %v1832_v5 = vld [vmem:[#allocation6 + $0x2c] sm:$0x8]  ;;  %v1809_v49 = vld [vmem:[#allocation6 + $0x5c] sm:$0xf] }
 0x2c3   : > { %1744 = vst [vmem:[#allocation6 + $0x30] sm:$0x1] %v1743_v56  ;;  %v1779_v1 = vor.u32 %v1778_v54, %v4664_v46  ;;  %v1812_v22 = vld [vmem:[#allocation6 + $0x68] sm:$0xf]  ;;  %v1702_v51 = vsel %vm4561_vm5, %v1665_v50, %v1701_v36  ;;  %v4678_v58 = vld [vmem:[#allocation6 + $0xc] sm:$0xff]  ;;  %v1833_v61 = vsel %vm4626_vm4, %v4567_v12, %v1832_v5  ;;  %v1720_v28 = vrot.slane %v4661_v44, 4 }
 0x2c4   : > { %v1826_v59 = vld [vmem:[#allocation6 + $0x14] sm:$0x8]  ;;  %v1829_v20 = vld [vmem:[#allocation6 + $0x20] sm:$0x8]  ;;  %v1777_v63 = vrot.slane %v1776_v43, 4  ;;  %v1705_v0 = vsel %vm4561_vm5, %v1672_v6, %v1704_v55  ;;  %v3931_v30 = vld [vmem:[%s5000_s2 + $0x30] sm:$0xff]  }
 0x2c5   : > { %1703 = vst [vmem:[#allocation6 + $0x54] sm:$0xf] %v1702_v51  ;;  %v4685_v2 = vld [vmem:[#allocation6 + $0x18] sm:$0xff]  ;;  %v1827_v60 = vsel %vm4626_vm4, %v4551_v25, %v1826_v59  ;;  %v1830_v3 = vsel %vm4626_vm4, %v4565_v62, %v1829_v20  ;;  %1834 = vst [vmem:[#allocation6 + $0x2c] sm:$0x8] %v1833_v61  ;;  %v1780_v12 = vrot.slane %v1779_v1, 4 }
 0x2c6   : > { %v1835_v4 = vld [vmem:[#allocation6 + $0x38] sm:$0x8]  ;;  %1706 = vst [vmem:[#allocation6 + $0x60] sm:$0xf] %v1705_v0  ;;  %v3370_v8 = vcombine.low %v4678_v58, %v4685_v2  ;;  %v3371_v9 = vcombine.high %v4678_v58, %v4685_v2  ;;  %1828 = vst [vmem:[#allocation6 + $0x14] sm:$0x8] %v1827_v60  ;;  %v1810_v29 = vsel %vm4577_vm1, %v1777_v63, %v1809_v49 }
 0x2c7   : > { %v3924_v25 = vld [vmem:[%s5000_s2 + $0x38] sm:$0xff]   ;;  %1831 = vst [vmem:[#allocation6 + $0x20] sm:$0x8] %v1830_v3  ;;  %v1836_v62 = vsel %vm4626_vm4, %v4591_v38, %v1835_v4  ;;  %v1745_v10 = vld [vmem:[#allocation6 + $0x3c] sm:$0x1]  ;;  %v1813_v15 = vsel %vm4577_vm1, %v1780_v12, %v1812_v22  ;;  %v4713_v17 = vld [vmem:[#allocation6 + $0x24] sm:$0xff]  ;;  %v3407_v60 = vcombine.high %v4685_v2, %v4678_v58 }
 0x2c8   : > { %1837 = vst [vmem:[#allocation6 + $0x38] sm:$0x8] %v1836_v62  ;;  %v1746_v14 = vsel %vm4615_vm8, %v1716_v47, %v1745_v10  ;;  %1811 = vst [vmem:[#allocation6 + $0x5c] sm:$0xf] %v1810_v29  ;;  %2230 = vmatprep.mubr.bf16.mxu1 %v3371_v9  ;;  %v3933_v32 = vld [vmem:[%s5000_s2 + $0x68] sm:$0xff]   ;;  %v1722_v19 = vrot.slane %v4664_v46, 4  ;;  %v4830_v10 = vcombine.high %v4685_v2, %v4713_v17 }
 0x2c9   : > { %1747 = vst [vmem:[#allocation6 + $0x3c] sm:$0x1] %v1746_v14  ;;  %1814 = vst [vmem:[#allocation6 + $0x68] sm:$0xf] %v1813_v15  ;;  %2231 = vmatmul.mubr.bf16.vlgmr.msra.gmra.mxu1 %v3370_v8  ;;  %v1838_v38 = vld [vmem:[#allocation6 + $0x44] sm:$0x8] }
 0x2ca   : > { %3621 = vmatpush3.bf16.msra.mxu1 %v3924_v25  ;;  %v4715_v18 = vld [vmem:[#allocation6 + $0x30] sm:$0xff]  ;;  %v1839_v26 = vsel %vm4626_vm4, %v4611_v23, %v1838_v38  ;;  %v3934_v33 = vld [vmem:[%s5000_s2 + $0x28] sm:$0xff]   ;;  %v3938_v40 = vld [vmem:[%s5000_s2 + $0x60] sm:$0xff]   ;;  %v3406_v25 = vcombine.low %v4685_v2, %v4678_v58 }
 0x2cb   : > { %v3374_v31 = vcombine.high %v4713_v17, %v4715_v18  ;;  %1840 = vst [vmem:[#allocation6 + $0x44] sm:$0x8] %v1839_v26  ;;  %3622 = vmatprep.subr.bf16.mxu1 %v3930_v13  ;;  %v3932_v23 = vld [vmem:[%s5000_s2 + $0xb0] sm:$0xff]   ;;  %v3373_v45 = vcombine.low %v4713_v17, %v4715_v18  ;;  %v3940_v11 = vld [vmem:[%s5000_s2 + $0x20] sm:$0xff]   ;;  %v3944_v55 = vld [vmem:[%s5000_s2 + $0x18] sm:$0xff]  }
 0x2cc   : > { %v1751_v27 = vld [vmem:[#allocation6 + $0x54] sm:$0x1]  ;;  %v4736_v34 = vld [vmem:[#allocation6 + $0x48] sm:$0xff]  ;;  %v3954_v3 = vld [vmem:[%s5000_s2 + $0x40] sm:$0xff]  }
 0x2cd   : > { %v1752_v21 = vsel %vm4615_vm8, %v1720_v28, %v1751_v27  ;;  %v1754_v35 = vld [vmem:[#allocation6 + $0x60] sm:$0x1]  ;;  %2238 = vmatprep.mubr.bf16.mxu1 %v3374_v31  ;;  %v3947_v43 = vld [vmem:[%s5000_s2 + $0x50] sm:$0xff]   ;;  %v3946_v22 = vld [vmem:[%s5000_s2 + $0x98] sm:$0xff]  }
 0x2ce   : > { %v3926_v37 = vld [vmem:[#allocation6 + $0x14] ss:$12 sps:$4 sm:$0xff]   ;;  %1753 = vst [vmem:[#allocation6 + $0x54] sm:$0x1] %v1752_v21  ;;  %v1755_v41 = vsel %vm4615_vm8, %v1722_v19, %v1754_v35  ;;  %3623 = vmatpush3.bf16.msra.mxu1 %v3931_v30  ;;  %v3948_v59 = vld [vmem:[%s5000_s2 + $0x10] sm:$0xff]   ;;  %v3950_v20 = vld [vmem:[%s5000_s2 + $0x48] sm:$0xff]   ;;  %v3409_v30 = vcombine.low %v4685_v2, %v4713_v17 }
 0x2cf   : > { %v3928_v44 = vld [vmem:[#allocation6 + $0x2c] ss:$12 sps:$4 sm:$0xff]   ;;  %v1844_v24 = vld [vmem:[#allocation6 + $0x5c] sm:$0x8]  ;;  %1756 = vst [vmem:[#allocation6 + $0x60] sm:$0x1] %v1755_v41  ;;  %3754 = vmatprep.mubr.bf16.mxu0 %v3926_v37  ;;  %3624 = vmatprep.subr.bf16.mxu1 %v3933_v32 }
 0x2d0   : > { %v4747_v46 = vld [vmem:[#allocation6 + $0x3c] sm:$0xff]  ;;  %v1845_v48 = vsel %vm4626_vm4, %v4655_v39, %v1844_v24  ;;  %v1847_v52 = vld [vmem:[#allocation6 + $0x68] sm:$0x8]  ;;  %3755 = vmatmul.mubr.bf16.vlgmr.msra.gmra.mxu0 %v3928_v44  ;;  %v3949_v61 = vld [vmem:[%s5000_s2 + $0x90] sm:$0xff]  }
 0x2d1   : > { %v1852_v36 = vld [vmem:[#allocation6 + $0x20] sm:$0xf]  ;;  %1846 = vst [vmem:[#allocation6 + $0x5c] sm:$0x8] %v1845_v48  ;;  %v1848_v53 = vsel %vm4626_vm4, %v4659_v42, %v1847_v52  ;;  %3763 = vmatpush3.bf16.msra.mxu0 %v4540_v57  ;;  %2239 = vmatmul.mubr.bf16.gmra.mxu1 %v3373_v45  ;;  %v3377_v39 = vcombine.high %v4747_v46, %v4736_v34  ;;  %v3952_v0 = vld [vmem:[%s5000_s2 + $0x8] sm:$0xff]   ;;  %v3957_v12 = vld [vmem:[%s5000_s2 + $0x1f8] sm:$0xff]  }
 0x2d2   : > { %1854 = vst [vmem:[#allocation6 + $0x8] sm:$0xf] %v1852_v36  ;;  %1849 = vst [vmem:[#allocation6 + $0x68] sm:$0x8] %v1848_v53  ;;  %v3929_v54 = vld [vmem:[#allocation6 + $0x44] ss:$12 sps:$4 sm:$0xff]   ;;  %3764 = vmatprep.subr.bf16.mxu0 %v3932_v23  ;;  %3625 = vmatpush3.bf16.msra.mxu1 %v3934_v33  ;;  %v3376_v56 = vcombine.low %v4747_v46, %v4736_v34  ;;  %v3413_v31 = vcombine.high %v4715_v18, %v4747_v46 }
 0x2d3   : > { %2246 = vmatprep.mubr.bf16.mxu1 %v3377_v39  ;;  %3626 = vmatprep.subr.bf16.mxu1 %v3938_v40  ;;  %v3941_v57 = vld [vmem:[%s5000_s2 + $0xa0] sm:$0xff]   ;;  %v3953_v4 = vld [vmem:[%s5000_s2 + $0x88] sm:$0xff]   ;;  %v3958_v9 = vld [vmem:[%s5000_s2 + $0x1b8] sm:$0xff]   ;;  %v3412_v21 = vcombine.low %v4715_v18, %v4747_v46 }
 0x2d4   : > { %3758 = vmatprep.mubr.bf16.mxu0 %v3929_v54  ;;  %v3955_v47 = vld [vmem:[%s5000_s2] sm:$0xff]   ;;  %v3962_v62 = vld [vmem:[%s5000_s2 + $0x1f0] sm:$0xff]   ;;  %v3960_v29 = vld [vmem:[%s5000_s2 + $0x238] sm:$0xff]  }
 0x2d5   : > { %v4767_v42 = vld [vmem:[#allocation6 + $0x54] sm:$0xff]  ;;  %3765 = vmatpush3.bf16.msra.mxu0 %v3932_v23  ;;  %v3956_v8 = vld [vmem:[%s5000_s2 + $0x80] sm:$0xff]   ;;  %v3963_v58 = vld [vmem:[%s5000_s2 + $0x1b0] sm:$0xff]  }
 0x2d6   : > { %v4769_v50 = vld [vmem:[#allocation6 + $0x60] sm:$0xff]  ;;  %3766 = vmatprep.subr.bf16.mxu0 %v3936_v16  ;;  %3627 = vmatpush3.bf16.msra.mxu1 %v3940_v11  ;;  %v3964_v15 = vld [vmem:[%s5000_s2 + $0x230] sm:$0xff]   ;;  %v3973_v17 = vld [vmem:[%s5000_s2 + $0x1d8] sm:$0xff]   ;;  %v3416_v37 = vcombine.high %v4736_v34, %v4767_v42  ;;  %v3415_v45 = vcombine.low %v4736_v34, %v4767_v42 }
 0x2d7   : > { %3628 = vmatprep.subr.bf16.mxu1 %v3942_v7  ;;  %v3499_v6 = vcombine.low %v4769_v50, %v4767_v42  ;;  %v3380_v49 = vcombine.high %v4767_v42, %v4769_v50  ;;  %v3379_v63 = vcombine.low %v4767_v42, %v4769_v50  ;;  %v3965_v13 = vld [vmem:[%s5000_s2 + $0x1e8] sm:$0xff]   ;;  %v3959_v14 = vld [vmem:[#allocation6 + $0x20] ss:$12 sps:$4 sm:$0xff]   ;;  %v3974_v33 = vld [vmem:[%s5000_s2 + $0x198] sm:$0xff]   ;;  %v3500_v11 = vcombine.high %v4769_v50, %v4767_v42 }
 0x2d8   : > { %v1857_v51 = vld [vmem:[#allocation6 + $0x5c] sm:$0xf]  ;;  %v3961_v38 = vld [vmem:[#allocation6 + $0x38] ss:$12 sps:$4 sm:$0xff]   ;;  %v3969_v23 = vld [vmem:[#allocation6 + $0x20] ss:$12 sps:$4 sm:$0xff]  }
 0x2d9   : > { %v3937_v5 = vld [vmem:[#allocation6 + $0x5c] ss:$12 sps:$4 sm:$0xff]   ;;  %3767 = vmatpush3.bf16.msra.mxu0 %v3936_v16  ;;  %2247 = vmatmul.mubr.bf16.gmra.mxu1 %v3376_v56  ;;  %1860 = vst [vmem:[#allocation6 + $0x74] sm:$0xf] %v1857_v51  ;;  %v3976_v35 = vld [vmem:[%s5000_s2 + $0x1d0] sm:$0xff]   ;;  %v3975_v40 = vld [vmem:[%s5000_s2 + $0x218] sm:$0xff]  }
 0x2da   : > { %v3939_v1 = vld [vmem:[#allocation6 + $0x8] ss:$12 sps:$4 sm:$0xff]   ;;  %3759 = vmatmul.mubr.bf16.gmra.mxu0 %v3937_v5  ;;  %3768 = vmatprep.subr.bf16.mxu0 %v3941_v57  ;;  %v3970_v28 = vld [vmem:[%s5000_s2 + $0x1e0] sm:$0xff]   ;;  %v3977_v18 = vld [vmem:[%s5000_s2 + $0x190] sm:$0xff]  }
 0x2db   : > { %3778 = vmatprep.mubr.bf16.mxu0 %v3939_v1  ;;  %3629 = vmatpush3.bf16.msra.mxu1 %v3944_v55  ;;  %v3966_v26 = vld [vmem:[%s5000_s2 + $0x1a8] sm:$0xff]   ;;  %v3971_v2 = vld [vmem:[%s5000_s2 + $0x1a0] sm:$0xff]   ;;  %v3978_v44 = vld [vmem:[%s5000_s2 + $0x210] sm:$0xff]  }
 0x2dc   : > { %2254 = vmatprep.mubr.bf16.mxu1 %v3380_v49  ;;  %3630 = vmatprep.subr.bf16.mxu1 %v3947_v43  ;;  %v3968_v32 = vld [vmem:[%s5000_s2 + $0x228] sm:$0xff]   ;;  %v3967_v19 = vld [vmem:[#allocation6 + $0x50] ss:$12 sps:$4 sm:$0xff]  }
 0x2dd   : > { %3769 = vmatpush3.bf16.msra.mxu0 %v3941_v57  ;;  %v3972_v27 = vld [vmem:[%s5000_s2 + $0x220] sm:$0xff]   ;;  %v3979_v41 = vld [vmem:[%s5000_s2 + $0x1c8] sm:$0xff]  }
 0x2de   : > { %3770 = vmatprep.subr.bf16.mxu0 %v3946_v22  ;;  %v3980_v24 = vld [vmem:[%s5000_s2 + $0x188] sm:$0xff]   ;;  %v3982_v46 = vld [vmem:[%s5000_s2 + $0x1c0] sm:$0xff]  }
 0x2df   : > { %3631 = vmatpush3.bf16.msra.mxu1 %v3948_v59  ;;  %v3981_v48 = vld [vmem:[%s5000_s2 + $0x208] sm:$0xff]   ;;  %v3983_v52 = vld [vmem:[%s5000_s2 + $0x180] sm:$0xff]  }
 0x2e0   : > { %3632 = vmatprep.subr.bf16.mxu1 %v3950_v20  ;;  %v3984_v34 = vld [vmem:[%s5000_s2 + $0x200] sm:$0xff]   ;;  %v3985_v36 = vld [vmem:[#allocation6 + $0x38] ss:$12 sps:$4 sm:$0xff]   ;;  %v3987_v53 = vld [vmem:[#allocation6 + $0x68] ss:$12 sps:$4 sm:$0xff]  }
 0x2e1   : > { %3771 = vmatpush3.bf16.msra.mxu0 %v3946_v22  ;;  %2255 = vmatmul.mubr.bf16.gmra.mxu1 %v3379_v63  ;;  %v3986_v16 = vld [vmem:[#allocation6 + $0x50] ss:$12 sps:$4 sm:$0xff]  }
 0x2e2   : > { %3772 = vmatprep.subr.bf16.mxu0 %v3949_v61  ;;  %2568 = vmatprep.mubr.bf16.mxu1 %v3407_v60 }
 0x2e3   : > { %3633 = vmatpush3.bf16.msra.mxu1 %v3952_v0 }
 0x2e4   : > { %3634 = vmatprep.subr.bf16.mxu1 %v3954_v3 }
 0x2e5   : > { %3773 = vmatpush3.bf16.msra.mxu0 %v3949_v61 }
 0x2e6   : > { %3774 = vmatprep.subr.bf16.mxu0 %v3953_v4 }
 0x2e7   : > { %3635 = vmatpush3.bf16.msra.mxu1 %v3955_v47 }
 0x2e8   : > { %3672 = vmatprep.subr.bf16.mxu1 %v3957_v12 }
 0x2e9   : > { %3775 = vmatpush3.bf16.msra.mxu0 %v3953_v4 }
 0x2ea   : > { %3776 = vmatprep.subr.bf16.mxu0 %v3956_v8  ;;  %2569 = vmatmul.mubr.bf16.vlgmr.msra.gmra.mxu1 %v3406_v25 }
 0x2eb   : > { %3673 = vmatpush3.bf16.msra.mxu1 %v3958_v9  ;;  %2576 = vmatprep.mubr.bf16.mxu1 %v4830_v10 }
 0x2ec   : > { %3674 = vmatprep.subr.bf16.mxu1 %v3962_v62 }
 0x2ed   : > { %3777 = vmatpush3.bf16.msra.mxu0 %v3956_v8 }
 0x2ee   : > { %3786 = vmatprep.subr.bf16.mxu0 %v3960_v29 }
 0x2ef   : > { %3675 = vmatpush3.bf16.msra.mxu1 %v3963_v58 }
 0x2f0   : > { %3779 = vmatmul.mubr.bf16.vlgmr.msra.gmra.mxu0 %v3959_v14  ;;  %3676 = vmatprep.subr.bf16.mxu1 %v3965_v13 }
 0x2f1   : > { %3782 = vmatprep.mubr.bf16.mxu0 %v3961_v38  ;;  %3787 = vmatpush3.bf16.msra.mxu0 %v3960_v29 }
 0x2f2   : > { %3788 = vmatprep.subr.bf16.mxu0 %v3964_v15  ;;  %2577 = vmatmul.mubr.bf16.gmra.mxu1 %v3409_v30 }
 0x2f3   : > { %3677 = vmatpush3.bf16.msra.mxu1 %v3966_v26  ;;  %2584 = vmatprep.mubr.bf16.mxu1 %v3413_v31 }
 0x2f4   : > { %3678 = vmatprep.subr.bf16.mxu1 %v3970_v28 }
 0x2f5   : > { %3789 = vmatpush3.bf16.msra.mxu0 %v3964_v15 }
 0x2f6   : > { %3790 = vmatprep.subr.bf16.mxu0 %v3968_v32 }
 0x2f7   : > { %3679 = vmatpush3.bf16.msra.mxu1 %v3971_v2 }
 0x2f8   : > { %3783 = vmatmul.mubr.bf16.gmra.mxu0 %v3967_v19  ;;  %3680 = vmatprep.subr.bf16.mxu1 %v3973_v17 }
 0x2f9   : > { %3791 = vmatpush3.bf16.msra.mxu0 %v3968_v32  ;;  %3802 = vmatprep.mubr.bf16.mxu0 %v3969_v23 }
 0x2fa   : > { %3792 = vmatprep.subr.bf16.mxu0 %v3972_v27  ;;  %2585 = vmatmul.mubr.bf16.gmra.mxu1 %v3412_v21 }
 0x2fb   : > { %3681 = vmatpush3.bf16.msra.mxu1 %v3974_v33  ;;  %2592 = vmatprep.mubr.bf16.mxu1 %v3416_v37 }
 0x2fc   : > { %3682 = vmatprep.subr.bf16.mxu1 %v3976_v35 }
 0x2fd   : > { %3793 = vmatpush3.bf16.msra.mxu0 %v3972_v27 }
 0x2fe   : > { %3794 = vmatprep.subr.bf16.mxu0 %v3975_v40 }
 0x2ff   : > { %3683 = vmatpush3.bf16.msra.mxu1 %v3977_v18 }
 0x300   : > { %3684 = vmatprep.subr.bf16.mxu1 %v3979_v41 }
 0x301   : > { %3795 = vmatpush3.bf16.msra.mxu0 %v3975_v40 }
 0x302   : > { %3796 = vmatprep.subr.bf16.mxu0 %v3978_v44  ;;  %2593 = vmatmul.mubr.bf16.gmra.mxu1 %v3415_v45 }
 0x303   : > { %3685 = vmatpush3.bf16.msra.mxu1 %v3980_v24  ;;  %2971 = vmatprep.mubr.bf16.mxu1 %v4830_v10 }
 0x304   : > { %3686 = vmatprep.subr.bf16.mxu1 %v3982_v46 }
 0x305   : > { %3797 = vmatpush3.bf16.msra.mxu0 %v3978_v44 }
 0x306   : > { %3798 = vmatprep.subr.bf16.mxu0 %v3981_v48 }
 0x307   : > { %3687 = vmatpush3.bf16.msra.mxu1 %v3983_v52 }
 0x309   : > { %3799 = vmatpush3.bf16.msra.mxu0 %v3981_v48 }
 0x30a   : > { %3800 = vmatprep.subr.bf16.mxu0 %v3984_v34  ;;  %2972 = vmatmul.mubr.bf16.vlgmr.msra.gmra.mxu1 %v3409_v30 }
 0x30b   : > { %2979 = vmatprep.mubr.bf16.mxu1 %v3413_v31 }
 0x30d   : > { %3801 = vmatpush3.bf16.msra.mxu0 %v3984_v34 }
 0x310   : > { %3803 = vmatmul.mubr.bf16.vlgmr.msra.gmra.mxu0 %v3985_v36 }
 0x311   : > { %3806 = vmatprep.mubr.bf16.mxu0 %v3986_v16 }
 0x312   : > { %2980 = vmatmul.mubr.bf16.gmra.mxu1 %v3412_v21 }
 0x313   : > { %2987 = vmatprep.mubr.bf16.mxu1 %v3416_v37 }
 0x318   : > { %3807 = vmatmul.mubr.bf16.gmra.mxu0 %v3987_v53 }
 0x31a   : > { %2988 = vmatmul.mubr.bf16.gmra.mxu1 %v3415_v45 }
 0x31b   : > { %2995 = vmatprep.mubr.bf16.mxu1 %v3500_v11 }
 0x322   : > { %2996 = vmatmul.mubr.bf16.gmra.mxu1 %v3499_v6 }
 0x389   : > { %v3584_v39 = vpop.f32.mrf.mxu1 }
 0x38b   : > { %v3585_v54 = vpop.f32.mrf.mxu1 }
 0x38c   : > { %v3586_v7 = vadd.f32 %v3585_v54, %v3584_v39 }
 0x38d   : > { %v3587_v57 = vpop.f32.mrf.mxu1 }
 0x38f   : > { %v3588_v55 = vpop.f32.mrf.mxu1 }
 0x390   : > { %v3589_v56 = vadd.f32 %v3588_v55, %v3587_v57  ;;  %v3756_v1 = vpop.f32.mrf.mxu0 }
 0x391   : > { %v3590_v43 = vpop.f32.mrf.mxu1 }
 0x392   : > { %v2297_v59 = vpop.f32.mrf.mxu0 }
 0x393   : > { %v3591_v5 = vpop.f32.mrf.mxu1  ;;  %v2298_v46 = vadd.f32 %v3586_v7, %v2297_v59 }
 0x394   : > { %v3592_v49 = vadd.f32 %v3591_v5, %v3590_v43  ;;  %v3757_v0 = vpop.f32.mrf.mxu0 }
 0x395   : > { %v3593_v22 = vpop.f32.mrf.mxu1 }
 0x396   : > { %v2300_v6 = vpop.f32.mrf.mxu0  ;;  %v2306_v57 = vadd.f32 %v3756_v1, %v3592_v49 }
 0x397   : > { %v3594_v51 = vpop.f32.mrf.mxu1  ;;  %v2301_v54 = vadd.f32 %v3589_v56, %v2300_v6 }
 0x398   : > { %v3595_v20 = vadd.f32 %v3594_v51, %v3593_v22 }
 0x399   : > { %v3596_v61 = vpop.f32.mrf.mxu1 }
 0x39a   : > { %v4920_v12 = vpop.f32.mrf.mxu0 }
 0x39b   : > { %v3597_v63 = vpop.f32.mrf.mxu1 }
 0x39c   : > { %v4912_v60 = vadd.f32 %v3597_v63, %v3596_v61  ;;  %v2313_v25 = vpop.f32.mrf.mxu0 }
 0x39d   : > { %v3599_v42 = vpop.f32.mrf.mxu1 }
 0x39e   : > { %v4926_v10 = vpop.f32.mrf.mxu0 }
 0x39f   : > { %v3600_v50 = vpop.f32.mrf.mxu1 }
 0x3a0   : > { %v4914_v3 = vadd.f32 %v3600_v50, %v3599_v42  ;;  %v4928_v13 = vpop.f32.mrf.mxu0  ;;  %v2309_v42 = vadd.f32 %v3757_v0, %v3595_v20 }
 0x3a1   : > { %v4916_v4 = vpop.f32.mrf.mxu1 }
 0x3a3   : > { %v4918_v47 = vpop.f32.mrf.mxu1 }
 0x3a5   : > { %v4922_v8 = vpop.f32.mrf.mxu1 }
 0x3a7   : > { %v4924_v9 = vpop.f32.mrf.mxu1 }
 0x3aa   : > { %v3636_v62 = vpop.f32.mrf.mxu1 }
 0x3ac   : > { %v3637_v29 = vpop.f32.mrf.mxu1 }
 0x3ad   : > { %v3638_v24 = vadd.f32 %v3637_v29, %v3636_v62 }
 0x3ae   : > { %v3639_v58 = vpop.f32.mrf.mxu1 }
 0x3af   : > { %v2571_v53 = vadd.f32 %v3638_v24, %v2298_v46 }
 0x3b0   : > { %v3640_v14 = vpop.f32.mrf.mxu1  ;;  %v3780_v15 = vpop.f32.mrf.mxu0 }
 0x3b1   : > { %v3641_v34 = vadd.f32 %v3640_v14, %v3639_v58 }
 0x3b2   : > { %v3642_v38 = vpop.f32.mrf.mxu1  ;;  %v2635_v30 = vpop.f32.mrf.mxu0 }
 0x3b3   : > { %v2574_v22 = vadd.f32 %v3641_v34, %v2301_v54  ;;  %v2636_v7 = vadd.f32 %v2635_v30, %v2571_v53 }
 0x3b4   : > { %v3643_v26 = vpop.f32.mrf.mxu1  ;;  %v3781_v32 = vpop.f32.mrf.mxu0 }
 0x3b5   : > { %v3644_v36 = vadd.f32 %v3643_v26, %v3642_v38 }
 0x3b6   : > { %v3645_v28 = vpop.f32.mrf.mxu1  ;;  %v2638_v19 = vpop.f32.mrf.mxu0 }
 0x3b7   : > { %v2579_v51 = vadd.f32 %v3644_v36, %v2306_v57  ;;  %v2639_v56 = vadd.f32 %v2638_v19, %v2574_v22  ;;  %v3607_v22 = vadd.f32 %v4924_v9, %v4922_v8 }
 0x3b8   : > { %v3646_v31 = vpop.f32.mrf.mxu1  ;;  %v4930_v33 = vpop.f32.mrf.mxu0 }
 0x3b9   : > { %v3647_v55 = vadd.f32 %v3646_v31, %v3645_v28  ;;  %v2644_v1 = vadd.f32 %v3780_v15, %v2579_v51  ;;  %v2314_v28 = vadd.f32 %v4912_v60, %v2313_v25  ;;  %v2325_v8 = vadd.f32 %v4926_v10, %v3607_v22 }
 0x3ba   : > { %v3648_v2 = vpop.f32.mrf.mxu1  ;;  %v2651_v37 = vpop.f32.mrf.mxu0 }
 0x3bb   : > { %v2582_v29 = vadd.f32 %v3647_v55, %v2309_v42 }
 0x3bc   : > { %v3649_v17 = vpop.f32.mrf.mxu1  ;;  %v4940_v41 = vpop.f32.mrf.mxu0 }
 0x3bd   : > { %v3650_v58 = vadd.f32 %v3649_v17, %v3648_v2  ;;  %v2647_v30 = vadd.f32 %v3781_v32, %v2582_v29  ;;  %v2317_v32 = vadd.f32 %v4914_v3, %v4928_v13 }
 0x3be   : > { %v3651_v27 = vpop.f32.mrf.mxu1  ;;  %v4942_v48 = vpop.f32.mrf.mxu0 }
 0x3c0   : > { %v3652_v23 = vpop.f32.mrf.mxu1 }
 0x3c1   : > { %v3653_v2 = vadd.f32 %v3652_v23, %v3651_v27  ;;  %v3604_v27 = vadd.f32 %v4918_v47, %v4916_v4 }
 0x3c2   : > { %v4932_v21 = vpop.f32.mrf.mxu1 }
 0x3c3   : > { %v2322_v13 = vadd.f32 %v4920_v12, %v3604_v27 }
 0x3c4   : > { %v4934_v35 = vpop.f32.mrf.mxu1 }
 0x3c5   : > { %v3656_v54 = vadd.f32 %v4934_v35, %v4932_v21 }
 0x3c6   : > { %v4936_v40 = vpop.f32.mrf.mxu1 }
 0x3c7   : > { %v2595_v35 = vadd.f32 %v3656_v54, %v2322_v13 }
 0x3c8   : > { %v4938_v18 = vpop.f32.mrf.mxu1 }
 0x3ca   : > { %v3688_v44 = vpop.f32.mrf.mxu1 }
 0x3cc   : > { %v3689_v45 = vpop.f32.mrf.mxu1 }
 0x3cd   : > { %v3690_v16 = vadd.f32 %v3689_v45, %v3688_v44  ;;  %v2587_v45 = vadd.f32 %v3650_v58, %v2314_v28 }
 0x3ce   : > { %v3691_v52 = vpop.f32.mrf.mxu1 }
 0x3d0   : > { %v3804_v11 = vpop.f32.mrf.mxu0  ;;  %v3692_v39 = vpop.f32.mrf.mxu1 }
 0x3d1   : > { %v3693_v63 = vadd.f32 %v3692_v39, %v3691_v52  ;;  %v2590_v39 = vadd.f32 %v3653_v2, %v2317_v32 }
 0x3d2   : > { %v3038_v43 = vpop.f32.mrf.mxu0  ;;  %v3694_v5 = vpop.f32.mrf.mxu1 }
 0x3d3   : > { %v3039_v61 = vadd.f32 %v3690_v16, %v3038_v43  ;;  %v2655_v21 = vadd.f32 %v4942_v48, %v2590_v39  ;;  %v2660_v48 = vadd.f32 %v4930_v33, %v2595_v35 }
 0x3d4   : > { %v3805_v59 = vpop.f32.mrf.mxu0  ;;  %v3695_v50 = vpop.f32.mrf.mxu1 }
 0x3d5   : > { %v3696_v62 = vadd.f32 %v3695_v50, %v3694_v5  ;;  %v4944_v14 = vadd.f32 %v3039_v61, %v2636_v7  ;;  %v3659_v7 = vadd.f32 %v4938_v18, %v4936_v40 }
 0x3d6   : > { %v3041_v38 = vpop.f32.mrf.mxu0  ;;  %v3697_v26 = vpop.f32.mrf.mxu1 }
 0x3d7   : > { %v3042_v49 = vadd.f32 %v3693_v63, %v3041_v38  ;;  %v3047_v6 = vadd.f32 %v3804_v11, %v3696_v62  ;;  %v3091_v17 = vmul.f32 %v4944_v14, %v4944_v14  ;;  %v2652_v11 = vadd.f32 %v2651_v37, %v2587_v45 }
 0x3d8   : > { %v3808_v31 = vpop.f32.mrf.mxu0  ;;  %v3698_v44 = vpop.f32.mrf.mxu1 }
 0x3d9   : > { %v4947_v24 = vadd.f32 %v3042_v49, %v2639_v56  ;;  %v4949_v20 = vadd.f32 %v3047_v6, %v2644_v1  ;;  %v3699_v0 = vadd.f32 %v3698_v44, %v3697_v26  ;;  %v2598_v26 = vadd.f32 %v3659_v7, %v2325_v8 }
 0x3da   : > { %v3054_v46 = vpop.f32.mrf.mxu0  ;;  %v3700_v19 = vpop.f32.mrf.mxu1 }
 0x3db   : > { %v3077_v15 = vadd.f32 %v4947_v24, %v4944_v14  ;;  %v3092_v60 = vmul.f32 %v4947_v24, %v4947_v24  ;;  %v3093_v25 = vmul.f32 %v4949_v20, %v4949_v20  ;;  %v3050_v52 = vadd.f32 %v3805_v59, %v3699_v0 }
 0x3dc   : > { %v3701_v23 = vpop.f32.mrf.mxu1  ;;  %v3809_v57 = vpop.f32.mrf.mxu0  ;;  %v2663_v44 = vadd.f32 %v4940_v41, %v2598_v26 }
 0x3dd   : > { %v3099_v34 = vadd.f32 %v3092_v60, %v3091_v17  ;;  %v3078_v36 = vadd.f32 %v3077_v15, %v4949_v20  ;;  %v4964_v16 = vadd.f32 %v3050_v52, %v2647_v30  ;;  %v3702_v53 = vadd.f32 %v3701_v23, %v3700_v19 }
 0x3de   : > { %v3703_v55 = vpop.f32.mrf.mxu1  ;;  %v3057_v63 = vpop.f32.mrf.mxu0 }
 0x3df   : > { %v3100_v43 = vadd.f32 %v3099_v34, %v3093_v25  ;;  %v3079_v3 = vadd.f32 %v3078_v36, %v4964_v16  ;;  %v3094_v4 = vmul.f32 %v4964_v16, %v4964_v16  ;;  %v3055_v47 = vadd.f32 %v3702_v53, %v3054_v46 }
 0x3e0   : > { %v3704_v5 = vpop.f32.mrf.mxu1 }
 0x3e1   : > { %v3101_v37 = vadd.f32 %v3100_v43, %v3094_v4  ;;  %v4974_v51 = vadd.f32 %v3055_v47, %v2652_v11  ;;  %v3705_v61 = vadd.f32 %v3704_v5, %v3703_v55 }
 0x3e2   : > { %v3706_v42 = vpop.f32.mrf.mxu1 }
 0x3e3   : > { %v3080_v59 = vadd.f32 %v3079_v3, %v4974_v51  ;;  %v3095_v12 = vmul.f32 %v4974_v51, %v4974_v51  ;;  %v3058_v50 = vadd.f32 %v3705_v61, %v3057_v63 }
 0x3e4   : > { %v3707_v62 = vpop.f32.mrf.mxu1 }
 0x3e5   : > { %v3102_v9 = vadd.f32 %v3101_v37, %v3095_v12  ;;  %v3074_v29 = vadd.f32 %v3058_v50, %v2655_v21  ;;  %v3708_v58 = vadd.f32 %v3707_v62, %v3706_v42 }
 0x3e6   : > { %v3709_v38 = vpop.f32.mrf.mxu1 }
 0x3e7   : > { %v3081_v56 = vadd.f32 %v3080_v59, %v3074_v29  ;;  %v3096_v1 = vmul.f32 %v3074_v29, %v3074_v29  ;;  %v3063_v49 = vadd.f32 %v3808_v31, %v3708_v58 }
 0x3e8   : > { %v3710_v40 = vpop.f32.mrf.mxu1 }
 0x3e9   : > { %v3103_v18 = vadd.f32 %v3102_v9, %v3096_v1  ;;  %v3075_v6 = vadd.f32 %v3063_v49, %v2660_v48  ;;  %v3711_v28 = vadd.f32 %v3710_v40, %v3709_v38 }
 0x3eb   : > { %v3082_v0 = vadd.f32 %v3081_v56, %v3075_v6  ;;  %v3097_v30 = vmul.f32 %v3075_v6, %v3075_v6  ;;  %v3066_v45 = vadd.f32 %v3809_v57, %v3711_v28 }
 0x3ed   : > { %v3104_v10 = vadd.f32 %v3103_v18, %v3097_v30  ;;  %v3076_v2 = vadd.f32 %v3066_v45, %v2663_v44 }
 0x3ef   : > { %v3083_v17 = vadd.f32 %v3082_v0, %v3076_v2  ;;  %v3098_v46 = vmul.f32 %v3076_v2, %v3076_v2 }
 0x3f1   : > { %v3084_v19 = vrot.slane %v3083_v17, 4  ;;  %v3105_v33 = vadd.f32 %v3104_v10, %v3098_v46 }
 0x3f3   : > { %v3085_v15 = vadd.f32 %v3084_v19, %v3083_v17  ;;  %v3106_v60 = vrot.slane %v3105_v33, 4 }
 0x3f5   : > { %v3086_v25 = vrot.slane %v3085_v15, 2  ;;  %v3107_v52 = vadd.f32 %v3106_v60, %v3105_v33 }
 0x3f7   : > { %v3087_v31 = vadd.f32 %v3086_v25, %v3085_v15  ;;  %v3108_v32 = vrot.slane %v3107_v52, 2 }
 0x3f9   : > { %v3088_v27 = vrot.slane %v3087_v31, 1  ;;  %v3109_v23 = vadd.f32 %v3108_v32, %v3107_v52 }
 0x3fb   : > { %v3089_v34 = vadd.f32 %v3088_v27, %v3087_v31  ;;  %v3110_v36 = vrot.slane %v3109_v23, 1 }
 0x3fd   : > { %v3090_v41 = vmul.f32 0.015625, %v3089_v34  ;;  %v3111_v53 = vadd.f32 %v3110_v36, %v3109_v23 }
 0x3ff   : > { %v3112_v11 = vmul.f32 0.015625, %v3111_v53  ;;  %v3113_v39 = vmul.f32 %v3090_v41, %v3090_v41  ;;  %v3116_v54 = vsub.f32 %v4944_v14, %v3090_v41  ;;  %v3117_v57 = vsub.f32 %v4947_v24, %v3090_v41 }
 0x400   : > { %v3118_v55 = vsub.f32 %v4949_v20, %v3090_v41  ;;  %v3119_v43 = vsub.f32 %v4964_v16, %v3090_v41  ;;  %v3120_v3 = vsub.f32 %v4974_v51, %v3090_v41  ;;  %v3121_v4 = vsub.f32 %v3074_v29, %v3090_v41 }
 0x401   : > { %v3114_v47 = vsub.f32 %v3112_v11, %v3113_v39  ;;  %v3122_v13 = vsub.f32 %v3075_v6, %v3090_v41  ;;  %v3123_v61 = vsub.f32 %v3076_v2, %v3090_v41 }
 0x403   : > { %v3115_v5 = vmax.f32 %v3114_v47, 0.0 }
 0x405   : > { %v3124_v22 = vadd.f32 1e-05, %v3115_v5 }
 0x407   : > { %3992 = vrsqrt.f32 %v3124_v22 }
 0x414   : > { %v3993_v37 = vpop.eup %3992 }
 0x415   : > { %v3126_v21 = vmul.f32 %v3993_v37, %v3116_v54  ;;  %v3127_v35 = vmul.f32 %v3993_v37, %v3117_v57  ;;  %v3128_v14 = vmul.f32 %v3993_v37, %v3118_v55  ;;  %v3129_v63 = vmul.f32 %v3993_v37, %v3119_v43 }
 0x416   : > { %v3130_v24 = vmul.f32 %v3993_v37, %v3120_v3  ;;  %v3131_v42 = vmul.f32 %v3993_v37, %v3121_v4  ;;  %v3132_v20 = vmul.f32 %v3993_v37, %v3122_v13  ;;  %v3133_v7 = vmul.f32 %v3993_v37, %v3123_v61 }
 0x417   : > { %v3134_v16 = vmax.f32 %v3126_v21, 0.0  ;;  %v3135_v59 = vmax.f32 %v3127_v35, 0.0  ;;  %v3136_v51 = vmax.f32 %v3128_v14, 0.0  ;;  %v3137_v12 = vmax.f32 %v3129_v63, 0.0 }
 0x418   : > { %v3138_v50 = vmax.f32 %v3130_v24, 0.0  ;;  %v3139_v62 = vmax.f32 %v3131_v42, 0.0  ;;  %v3140_v8 = vmax.f32 %v3132_v20, 0.0  ;;  %v3141_v9 = vmax.f32 %v3133_v7, 0.0 }
 0x419   : > { %v3541_v29 = vpack.c.bf16 %v3135_v59, %v3134_v16  ;;  %v3546_v58 = vpack.c.bf16 %v3137_v12, %v3136_v51 }
 0x41a   : > { %v3551_v48 = vpack.c.bf16 %v3139_v62, %v3138_v50  ;;  %v3556_v38 = vpack.c.bf16 %v3141_v9, %v3140_v8 }
 0x41b   : > { %3542 = vst [vmem:[%s170_s10] sm:$0xff] %v3541_v29   ;;  %3558 = vst [vmem:[%s170_s10 + $0x8] sm:$0xff] %v3546_v58  }
 0x41c   : > { %3559 = vst [vmem:[%s170_s10 + $0x10] sm:$0xff] %v3551_v48   ;;  %3560 = vst [vmem:[%s170_s10 + $0x18] sm:$0xff] %v3556_v38  }
 0x41d PF: > { %s13_s12 = sadd.s32 1, %s4000_s12  }
 0x41e   : > { %p10_p4 = scmp.ge.s32.totalorder %s13_s12, 4  }
 0x420   :  { %12 = sbr.rel (!%p10_p4) target bundleno = 1 (0x1), region = 70 }

</bundles_post_ra>
